<compile_context>
chip_gen: v6e
topology: v6e:2x2x1
jax: 0.10.0
libtpu: 0.0.40
codegen_flags: <defaults>
</compile_context>

<pallas_src>
import functools

import jax
import jax.numpy as jnp
from jax.experimental import pallas as pl
from jax.experimental.pallas import tpu as pltpu


def _mhsa_kernel(x_ref, wq_ref, wkv_ref, wout_ref, o_ref, kv_ref, *,
                 num_heads, head_size, q_block, kv_proj_chunk):
    # x_ref:    (C, E)        full context for the current batch element
    # wq_ref:   (E, HD)       Q projection weight (lane-dense input, no slicing)
    # wkv_ref:  (E, 2*HD)     fused K/V projection weight
    # wout_ref: (HD, E_pad)   output projection weight (zero-padded, lane dense)
    # o_ref:    (tq, E_pad)   output rows for this query tile
    # kv_ref:   (C, 2*HD)     VMEM scratch: K|V for whole context, persists
    #                         across the (in-order, "arbitrary") q-tile axis.
    H, Dh = num_heads, head_size
    HD = H * Dh
    C, E = x_ref.shape
    tq = tk = q_block
    cdt = kv_ref.dtype          # MXU-operand/storage dtype; softmax math stays f32

    qi = pl.program_id(1)

    # ---- K/V projection (whole context), once per batch element, chunked ----
    n_chunks = C // kv_proj_chunk

    @pl.when(qi == 0)
    def _():
        @pl.loop(0, n_chunks)
        def _(c):
            r0 = pl.multiple_of(c * kv_proj_chunk, kv_proj_chunk)
            x_chunk = x_ref[pl.ds(r0, kv_proj_chunk), :].astype(cdt)
            kv = jnp.dot(x_chunk, wkv_ref[...].astype(cdt),
                         preferred_element_type=jnp.float32)
            kv_ref[pl.ds(r0, kv_proj_chunk), :] = kv.astype(cdt)

    # ---- Q projection for this query tile (1/sqrt(Dh) folded in) ------------
    q_start = pl.multiple_of(qi * tq, tq)
    x_q = x_ref[pl.ds(q_start, tq), :].astype(cdt)                  # (tq, E)
    scale = 1.0 / (Dh ** 0.5)
    q_all = (jnp.dot(x_q, wq_ref[...].astype(cdt),
                     preferred_element_type=jnp.float32) * scale
             ).astype(cdt)                                          # (tq, HD)

    # Causal mask is only needed on the diagonal tile (kv_start == q_start,
    # tq == tk).  Causal-only: rows are never fully masked.
    row = jax.lax.broadcasted_iota(jnp.int32, (tq, tk), 0)
    col = jax.lax.broadcasted_iota(jnp.int32, (tq, tk), 1)
    diag_bias = jnp.where(col > row, -1e30, 0.0)

    # ---- attention: head-outer / kv-tile-inner online softmax ---------------
    out_acc = None                                                  # (tq, E_pad) f32
    for h in range(H):
        q_h = q_all[:, h * Dh:(h + 1) * Dh]                         # (tq, Dh)

        def kv_step(j, carry, q_h=q_h, h=h):
            m, l, acc = carry
            kv_start = pl.multiple_of(j * tk, tk)
            k_h = kv_ref[pl.ds(kv_start, tk), pl.ds(h * Dh, Dh)]    # (tk, Dh)
            v_h = kv_ref[pl.ds(kv_start, tk), pl.ds(HD + h * Dh, Dh)]
            s = jax.lax.dot_general(q_h, k_h, (((1,), (1,)), ((), ())),
                                    preferred_element_type=jnp.float32)
            m_new = jnp.maximum(m, jnp.max(s, axis=-1, keepdims=True))
            alpha = jnp.exp(m - m_new)
            p = jnp.exp(s - m_new)
            l_new = alpha * l + jnp.sum(p, axis=-1, keepdims=True)
            pv = jnp.dot(p.astype(cdt), v_h,
                         preferred_element_type=jnp.float32)        # (tq, Dh)
            return m_new, l_new, alpha * acc + pv

        init = (jnp.full((tq, 1), -1e30, jnp.float32),
                jnp.zeros((tq, 1), jnp.float32),
                jnp.zeros((tq, Dh), jnp.float32))
        # Strictly sub-diagonal tiles: no masking work; dynamic trip count also
        # skips every tile above the diagonal (~2x FLOP saving at large C).
        m, l, acc = jax.lax.fori_loop(0, qi, kv_step, init)
        # TODO(synk): 2-way manual unroll of this loop (with remainder) is a
        # few-% win when EUP exp() is the saturating slot.

        # Diagonal tile: the only one that needs the causal bias.
        k_h = kv_ref[pl.ds(q_start, tk), pl.ds(h * Dh, Dh)]
        v_h = kv_ref[pl.ds(q_start, tk), pl.ds(HD + h * Dh, Dh)]
        s = jax.lax.dot_general(q_h, k_h, (((1,), (1,)), ((), ())),
                                preferred_element_type=jnp.float32) + diag_bias
        m_new = jnp.maximum(m, jnp.max(s, axis=-1, keepdims=True))
        alpha = jnp.exp(m - m_new)
        p = jnp.exp(s - m_new)
        l = alpha * l + jnp.sum(p, axis=-1, keepdims=True)
        acc = alpha * acc + jnp.dot(p.astype(cdt), v_h,
                                    preferred_element_type=jnp.float32)

        # Finalize this head and fold it straight into the output projection:
        # no (tq, HD) scratch round-trip, no masked sub-128-lane stores.
        o_h = (acc * pl.reciprocal(l, approx=True)).astype(cdt)     # (tq, Dh)
        w_h = wout_ref[pl.ds(h * Dh, Dh), :].astype(cdt)            # (Dh, E_pad)
        partial = jnp.dot(o_h, w_h, preferred_element_type=jnp.float32)
        out_acc = partial if out_acc is None else out_acc + partial

    o_ref[...] = out_acc.astype(o_ref.dtype)                        # lane-dense store


def _weight_spec(shape, pipeline_mode):
    if pipeline_mode is None:
        return pl.BlockSpec(shape, lambda b, q: (0, 0))
    return pl.BlockSpec(shape, lambda b, q: (0, 0), pipeline_mode=pipeline_mode)


def _tpu_defaults():
    """Per-generation tile size / scoped-VMEM / storage-dtype defaults."""
    kind = ""
    try:
        kind = jax.devices()[0].device_kind.lower()
    except Exception:
        pass
    if "v7" in kind:   # 64 MiB VMEM/TC: bf16 storage, leave compiler headroom
        return dict(vmem_limit=40 * 1024 * 1024, max_tile=128, cdt=jnp.bfloat16)
    if "v6" in kind:   # 128 MiB VMEM, 256x256 MXU: larger tiles pay off
        return dict(vmem_limit=100 * 1024 * 1024, max_tile=256, cdt=jnp.float32)
    if "v5" in kind:   # 128x128 MXU already saturated at 128-wide tiles
        return dict(vmem_limit=100 * 1024 * 1024, max_tile=128, cdt=jnp.float32)
    return dict(vmem_limit=64 * 1024 * 1024, max_tile=128, cdt=jnp.float32)


def multi_head_self_attention(x, w_qkv, w_out, *, num_heads, head_size,
                              compute_dtype=None, q_block=None):
    """x: (B, C, E) -> (B, C, E).  w_qkv: (E, 3*H*Dh), w_out: (H*Dh, E)."""
    B, C, E = x.shape
    H, Dh = num_heads, head_size
    HD = H * Dh
    assert w_qkv.shape == (E, 3 * HD)
    assert w_out.shape == (HD, E)
    out_dtype = x.dtype

    cfg = _tpu_defaults()
    if compute_dtype is None:
        compute_dtype = cfg["cdt"]

    # Lane-dense output store: pad the output-projection width to 128 lanes.
    E_pad = ((E + 127) // 128) * 128
    if E_pad != E:
        w_out = jnp.pad(w_out, ((0, 0), (0, E_pad - E)))

    # Split the fused QKV weight so the kernel never slices a weight ref at a
    # non-lane-aligned (HD % 128 != 0) offset; both pieces are full-block inputs.
    w_q = w_qkv[:, :HD]
    w_kv = w_qkv[:, HD:]

    # bf16 storage halves HBM traffic + resident VMEM; all matmuls still
    # accumulate in f32 inside the kernel and softmax statistics stay f32.
    x_c = x.astype(compute_dtype)
    w_q_c = w_q.astype(compute_dtype)
    w_kv_c = w_kv.astype(compute_dtype)
    w_out_c = w_out.astype(compute_dtype)

    # Query/KV tile size (tq == tk).
    if q_block is None:
        if C <= cfg["max_tile"]:
            q_block = C
        else:
            q_block = next((t for t in (cfg["max_tile"], 128, 64, 32, 16, 8)
                            if C % t == 0), C)
    assert C % q_block == 0, "context length must be divisible by the q tile"
    n_q = C // q_block

    # Chunk size for the one-shot K/V projection (bounds its f32 temporary).
    kv_chunk = q_block
    for cand in (512, 256):
        if cand > q_block and C % cand == 0:
            kv_chunk = cand
            break

    kernel = functools.partial(_mhsa_kernel, num_heads=H, head_size=Dh,
                               q_block=q_block, kv_proj_chunk=kv_chunk)

    itemsize = jnp.dtype(compute_dtype).itemsize
    bytes_in = (B * C * E + E * 3 * HD + HD * E_pad) * itemsize
    bytes_out = B * C * E_pad * jnp.dtype(out_dtype).itemsize
    cost = pl.CostEstimate(
        flops=int(2 * B * C * E * 3 * HD          # QKV projection
                  + 2 * B * H * C * C * Dh        # QK^T + PV (causal ~0.5 each)
                  + 2 * B * C * HD * E_pad),      # output projection
        transcendentals=int(B * H * C * C // 2),
        bytes_accessed=int(bytes_in + bytes_out))

    def build_and_run(weight_pm):
        grid_spec = pltpu.PrefetchScalarGridSpec(
            num_scalar_prefetch=0,
            grid=(B, n_q),
            in_specs=[
                # Full context per batch element; only re-DMA'd when b changes.
                pl.BlockSpec((pl.Squeezed(), C, E), lambda b, q: (b, 0, 0)),
                # Grid-invariant weights (fetched once; optionally single-buffered).
                _weight_spec((E, HD), weight_pm),
                _weight_spec((E, 2 * HD), weight_pm),
                _weight_spec((HD, E_pad), weight_pm),
            ],
            out_specs=pl.BlockSpec((pl.Squeezed(), q_block, E_pad),
                                   lambda b, q: (b, q, 0)),
            scratch_shapes=[
                pltpu.VMEM((C, 2 * HD), compute_dtype),   # persistent K/V cache
            ],
        )
        return pl.pallas_call(
            kernel,
            out_shape=jax.ShapeDtypeStruct((B, C, E_pad), out_dtype),
            grid_spec=grid_spec,
            compiler_params=pltpu.CompilerParams(
                # TODO(synk): on v7x with B == 1 add a parallel head-group grid
                # axis (heads are independent once K/V exists) so both
                # TensorCores are used; with B >= 2 the batch axis covers it.
                dimension_semantics=("parallel", "arbitrary"),
                vmem_limit_bytes=cfg["vmem_limit"]),
            cost_estimate=cost,
        )(x_c, w_q_c, w_kv_c, w_out_c)

    try:
        # Grid-invariant weight blocks never change -> single-buffer them to
        # halve their resident VMEM footprint (matters on v7x's 64 MiB).
        out = build_and_run(pl.Buffered(1))
    except Exception:
        # Fallback for jax versions where Buffered(1) does not lower.
        out = build_and_run(None)

    if E_pad != E:
        out = out[..., :E]
    return out


def _reference(x, w_qkv, w_out, *, num_heads, head_size):
    """Pure-JAX f32 reference mirroring the PyTorch forward exactly."""
    B, C, E = x.shape
    H, Dh = num_heads, head_size
    qkv = x @ w_qkv
    q, k, v = jnp.split(qkv, 3, axis=2)
    q = q.reshape(B, C, H, Dh).transpose(0, 2, 1, 3)
    k = k.reshape(B, C, H, Dh).transpose(0, 2, 1, 3)
    v = v.reshape(B, C, H, Dh).transpose(0, 2, 1, 3)
    sa = jnp.einsum('bhqd,bhkd->bhqk', q, k)
    mask = ~jnp.tril(jnp.ones((C, C), dtype=bool))
    masked = jnp.where(mask, -jnp.inf, sa)
    probs = jax.nn.softmax(masked * (1.0 / Dh ** 0.5), axis=3)
    att = jnp.einsum('bhqk,bhkd->bhqd', probs, v)
    flat = att.transpose(0, 2, 1, 3).reshape(B, C, H * Dh)
    return flat @ w_out


if __name__ == "__main__":
    # Small config consistent with the module: B=2, C(seq)=16, E=32, H=4, Dh=8.
    B, C, E = 2, 16, 32
    H, Dh = 4, 8

    key = jax.random.PRNGKey(0)
    kx, kq, ko = jax.random.split(key, 3)

    x = jax.random.normal(kx, (B, C, E), dtype=jnp.float32)
    # attention_bias=False in the config -> no bias terms.
    w_qkv = jax.random.normal(kq, (E, 3 * H * Dh), dtype=jnp.float32) * (E ** -0.5)
    w_out = jax.random.normal(ko, (H * Dh, E), dtype=jnp.float32) * ((H * Dh) ** -0.5)

    ref = _reference(x, w_qkv, w_out, num_heads=H, head_size=Dh)

    # f32 compute path.
    out_f32 = multi_head_self_attention(
        x, w_qkv, w_out, num_heads=H, head_size=Dh, compute_dtype=jnp.float32)
    out_f32 = jax.block_until_ready(out_f32)
    assert out_f32.shape == (B, C, E)
    assert jnp.allclose(out_f32, ref, atol=5e-3, rtol=5e-3), "f32 mismatch vs reference"

    # bf16 weights/activations path (f32 accumulation inside the kernel).
    out_bf16 = multi_head_self_attention(
        x, w_qkv, w_out, num_heads=H, head_size=Dh, compute_dtype=jnp.bfloat16)
    out_bf16 = jax.block_until_ready(out_bf16)
    assert out_bf16.shape == (B, C, E)
    assert jnp.allclose(out_bf16, ref, atol=5e-2, rtol=5e-2), "bf16 mismatch vs reference"

    print("KERNEL_OK")
</pallas_src>

<mosaic_0001>
module attributes {stable_mosaic.version = 11 : i64} {
  func.func @_mhsa_kernel(%arg0: i32, %arg1: i32, %arg2: memref<1x16x32xf32, #tpu.memory_space<vmem>>, %arg3: memref<32x32xf32, #tpu.memory_space<vmem>>, %arg4: memref<32x64xf32, #tpu.memory_space<vmem>>, %arg5: memref<32x128xf32, #tpu.memory_space<vmem>>, %arg6: memref<1x16x128xf32, #tpu.memory_space<vmem>>, %arg7: memref<16x64xf32, #tpu.memory_space<vmem>>) attributes {dimension_semantics = [#tpu.dimension_semantics<parallel>, #tpu.dimension_semantics<arbitrary>], iteration_bounds = array<i64: 2, 1>, scalar_prefetch = 0 : i64, scratch_operands = 1 : i64, tpu.core_type = #tpu.core_type<tc>, window_params = [{transform_indices = @transform_0, window_bounds = array<i64: 1, 16, 32>}, {pipeline_mode = #tpu.pipeline_mode<synchronous>, transform_indices = @transform_1, window_bounds = array<i64: 32, 32>}, {pipeline_mode = #tpu.pipeline_mode<synchronous>, transform_indices = @transform_2, window_bounds = array<i64: 32, 64>}, {pipeline_mode = #tpu.pipeline_mode<synchronous>, transform_indices = @transform_3, window_bounds = array<i64: 32, 128>}, {transform_indices = @transform_4, window_bounds = array<i64: 1, 16, 128>}]} {
    %c0_i32 = arith.constant 0 : i32
    %0 = arith.cmpi eq, %arg1, %c0_i32 : i32
    %1 = arith.extui %0 : i1 to i32
    %c0_i32_0 = arith.constant 0 : i32
    %2 = arith.cmpi ne, %1, %c0_i32_0 : i32
    scf.if %2 {
      %c0_i32_58 = arith.constant 0 : i32
      %c1_i32_59 = arith.constant 1 : i32
      %160 = arith.muli %c0_i32_58, %c1_i32_59 : i32
      %c0_i32_60 = arith.constant 0 : i32
      %161 = arith.addi %c0_i32_60, %160 : i32
      %c16_i32_61 = arith.constant 16 : i32
      %162 = arith.muli %161, %c16_i32_61 : i32
      %163 = tpu.assume_multiple %162, 16 : i32
      %c0_62 = arith.constant 0 : index
      %164 = arith.index_cast %163 : i32 to index
      %c0_63 = arith.constant 0 : index
      %165 = vector.load %arg2[%c0_62, %164, %c0_63] : memref<1x16x32xf32, #tpu.memory_space<vmem>>, vector<1x16x32xf32>
      %166 = vector.shape_cast %165 : vector<1x16x32xf32> to vector<16x32xf32>
      %c0_64 = arith.constant 0 : index
      %c0_65 = arith.constant 0 : index
      %167 = vector.load %arg4[%c0_64, %c0_65] : memref<32x64xf32, #tpu.memory_space<vmem>>, vector<32x64xf32>
      %cst_66 = arith.constant dense<0.000000e+00> : vector<16x64xf32>
      %168 = tpu.matmul %166, %167, %cst_66 {dimension_numbers = #tpu.dot_dimension_numbers<[1], [0], [0], [1], [0, 0, 1, 1], [], []>} : vector<16x32xf32>, vector<32x64xf32>, vector<16x64xf32> -> vector<16x64xf32>
      %169 = arith.index_cast %163 : i32 to index
      %c0_67 = arith.constant 0 : index
      %170 = vector.load %arg7[%169, %c0_67] : memref<16x64xf32, #tpu.memory_space<vmem>>, vector<16x64xf32>
      tpu.vector_store %arg7[%169, %c0_67], %168 {strides = array<i32>} : memref<16x64xf32, #tpu.memory_space<vmem>>, vector<16x64xf32>,
      %c1_i32_68 = arith.constant 1 : i32
    } else {
    }
    %c16_i32 = arith.constant 16 : i32
    %3 = arith.muli %arg1, %c16_i32 : i32
    %4 = tpu.assume_multiple %3, 16 : i32
    %c0 = arith.constant 0 : index
    %5 = arith.index_cast %4 : i32 to index
    %c0_1 = arith.constant 0 : index
    %6 = vector.load %arg2[%c0, %5, %c0_1] : memref<1x16x32xf32, #tpu.memory_space<vmem>>, vector<1x16x32xf32>
    %7 = vector.shape_cast %6 : vector<1x16x32xf32> to vector<16x32xf32>
    %c0_2 = arith.constant 0 : index
    %c0_3 = arith.constant 0 : index
    %8 = vector.load %arg3[%c0_2, %c0_3] : memref<32x32xf32, #tpu.memory_space<vmem>>, vector<32x32xf32>
    %cst = arith.constant dense<0.000000e+00> : vector<16x32xf32>
    %9 = tpu.matmul %7, %8, %cst {dimension_numbers = #tpu.dot_dimension_numbers<[1], [0], [0], [1], [0, 0, 1, 1], [], []>} : vector<16x32xf32>, vector<32x32xf32>, vector<16x32xf32> -> vector<16x32xf32>
    %cst_4 = arith.constant 0.353553385 : f32
    %10 = vector.broadcast %cst_4 : f32 to vector<16x32xf32>
    %11 = arith.mulf %9, %10 : vector<16x32xf32>
    %12 = tpu.iota {dimensions = array<i32: 0>} : vector<16x16xi32>
    %13 = tpu.iota {dimensions = array<i32: 1>} : vector<16x16xi32>
    %14 = arith.cmpi sgt, %13, %12 : vector<16x16xi32>
    %cst_5 = arith.constant -1.000000e+30 : f32
    %cst_6 = arith.constant 0.000000e+00 : f32
    %15 = vector.broadcast %cst_5 : f32 to vector<16x16xf32>
    %16 = vector.broadcast %cst_6 : f32 to vector<16x16xf32>
    %17 = arith.select %14, %15, %16 : vector<16x16xi1>, vector<16x16xf32>
    %18 = vector.extract_strided_slice %11 {offsets = [0, 0], sizes = [16, 8], strides = [1, 1]} : vector<16x32xf32> to vector<16x8xf32>
    %cst_7 = arith.constant -1.000000e+30 : f32
    %19 = vector.broadcast %cst_7 : f32 to vector<16x1xf32>
    %cst_8 = arith.constant 0.000000e+00 : f32
    %20 = vector.broadcast %cst_8 : f32 to vector<16x1xf32>
    %cst_9 = arith.constant 0.000000e+00 : f32
    %21 = vector.broadcast %cst_9 : f32 to vector<16x8xf32>
    %c0_i32_10 = arith.constant 0 : i32
    %22 = arith.subi %arg1, %c0_i32_10 : i32
    %23 = arith.addi %c0_i32_10, %22 : i32
    %c1_i32 = arith.constant 1 : i32
    %24:3 = scf.for %arg8 = %c0_i32_10 to %23 step %c1_i32 iter_args(%arg9 = %19, %arg10 = %20, %arg11 = %21) -> (vector<16x1xf32>, vector<16x1xf32>, vector<16x8xf32>)  : i32 {
      %c16_i32_58 = arith.constant 16 : i32
      %160 = arith.muli %arg8, %c16_i32_58 : i32
      %161 = tpu.assume_multiple %160, 16 : i32
      %162 = arith.index_cast %161 : i32 to index
      %c0_59 = arith.constant 0 : index
      %163 = vector.load %arg7[%162, %c0_59] : memref<16x64xf32, #tpu.memory_space<vmem>>, vector<16x8xf32>
      %164 = arith.index_cast %161 : i32 to index
      %c32_60 = arith.constant 32 : index
      %165 = vector.load %arg7[%164, %c32_60] : memref<16x64xf32, #tpu.memory_space<vmem>>, vector<16x8xf32>
      %cst_61 = arith.constant dense<0.000000e+00> : vector<16x16xf32>
      %166 = tpu.matmul %18, %163, %cst_61 {dimension_numbers = #tpu.dot_dimension_numbers<[1], [1], [0], [0], [0, 0, 1, 0], [], []>} : vector<16x8xf32>, vector<16x8xf32>, vector<16x16xf32> -> vector<16x16xf32>
      %cst_62 = arith.constant dense<0xFF800000> : vector<16xf32>
      %167 = vector.multi_reduction <maximumf>, %166, %cst_62 [1] : vector<16x16xf32> to vector<16xf32>
      %168 = vector.shape_cast %167 : vector<16xf32> to vector<16x1xf32>
      %169 = arith.maximumf %arg9, %168 : vector<16x1xf32>
      %170 = arith.subf %arg9, %169 : vector<16x1xf32>
      %171 = math.exp %170 : vector<16x1xf32>
      %172 = vector.broadcast %169 : vector<16x1xf32> to vector<16x16xf32>
      %173 = arith.subf %166, %172 : vector<16x16xf32>
      %174 = math.exp %173 : vector<16x16xf32>
      %175 = arith.mulf %171, %arg10 : vector<16x1xf32>
      %cst_63 = arith.constant dense<0.000000e+00> : vector<16xf32>
      %176 = vector.multi_reduction <add>, %174, %cst_63 [1] : vector<16x16xf32> to vector<16xf32>
      %177 = vector.shape_cast %176 : vector<16xf32> to vector<16x1xf32>
      %178 = arith.addf %175, %177 : vector<16x1xf32>
      %cst_64 = arith.constant dense<0.000000e+00> : vector<16x8xf32>
      %179 = tpu.matmul %174, %165, %cst_64 {dimension_numbers = #tpu.dot_dimension_numbers<[1], [0], [0], [1], [0, 0, 1, 1], [], []>} : vector<16x16xf32>, vector<16x8xf32>, vector<16x8xf32> -> vector<16x8xf32>
      %180 = vector.broadcast %171 : vector<16x1xf32> to vector<16x8xf32>
      %181 = arith.mulf %180, %arg11 : vector<16x8xf32>
      %182 = arith.addf %181, %179 : vector<16x8xf32>
      scf.yield %169, %178, %182 : vector<16x1xf32>, vector<16x1xf32>, vector<16x8xf32>
    }
    %25 = arith.index_cast %4 : i32 to index
    %c0_11 = arith.constant 0 : index
    %26 = vector.load %arg7[%25, %c0_11] : memref<16x64xf32, #tpu.memory_space<vmem>>, vector<16x8xf32>
    %27 = arith.index_cast %4 : i32 to index
    %c32 = arith.constant 32 : index
    %28 = vector.load %arg7[%27, %c32] : memref<16x64xf32, #tpu.memory_space<vmem>>, vector<16x8xf32>
    %cst_12 = arith.constant dense<0.000000e+00> : vector<16x16xf32>
    %29 = tpu.matmul %18, %26, %cst_12 {dimension_numbers = #tpu.dot_dimension_numbers<[1], [1], [0], [0], [0, 0, 1, 0], [], []>} : vector<16x8xf32>, vector<16x8xf32>, vector<16x16xf32> -> vector<16x16xf32>
    %30 = arith.addf %29, %17 : vector<16x16xf32>
    %cst_13 = arith.constant dense<0xFF800000> : vector<16xf32>
    %31 = vector.multi_reduction <maximumf>, %30, %cst_13 [1] : vector<16x16xf32> to vector<16xf32>
    %32 = vector.shape_cast %31 : vector<16xf32> to vector<16x1xf32>
    %33 = arith.maximumf %24#0, %32 : vector<16x1xf32>
    %34 = arith.subf %24#0, %33 : vector<16x1xf32>
    %35 = math.exp %34 : vector<16x1xf32>
    %36 = vector.broadcast %33 : vector<16x1xf32> to vector<16x16xf32>
    %37 = arith.subf %30, %36 : vector<16x16xf32>
    %38 = math.exp %37 : vector<16x16xf32>
    %39 = arith.mulf %35, %24#1 : vector<16x1xf32>
    %cst_14 = arith.constant dense<0.000000e+00> : vector<16xf32>
    %40 = vector.multi_reduction <add>, %38, %cst_14 [1] : vector<16x16xf32> to vector<16xf32>
    %41 = vector.shape_cast %40 : vector<16xf32> to vector<16x1xf32>
    %42 = arith.addf %39, %41 : vector<16x1xf32>
    %43 = vector.broadcast %35 : vector<16x1xf32> to vector<16x8xf32>
    %44 = arith.mulf %43, %24#2 : vector<16x8xf32>
    %cst_15 = arith.constant dense<0.000000e+00> : vector<16x8xf32>
    %45 = tpu.matmul %38, %28, %cst_15 {dimension_numbers = #tpu.dot_dimension_numbers<[1], [0], [0], [1], [0, 0, 1, 1], [], []>} : vector<16x16xf32>, vector<16x8xf32>, vector<16x8xf32> -> vector<16x8xf32>
    %46 = arith.addf %44, %45 : vector<16x8xf32>
    %47 = tpu.reciprocal %42 {approx = true} : vector<16x1xf32> -> vector<16x1xf32>
    %48 = vector.broadcast %47 : vector<16x1xf32> to vector<16x8xf32>
    %49 = arith.mulf %46, %48 : vector<16x8xf32>
    %c0_16 = arith.constant 0 : index
    %c0_17 = arith.constant 0 : index
    %50 = vector.load %arg5[%c0_16, %c0_17] : memref<32x128xf32, #tpu.memory_space<vmem>>, vector<8x128xf32>
    %cst_18 = arith.constant dense<0.000000e+00> : vector<16x128xf32>
    %51 = tpu.matmul %49, %50, %cst_18 {dimension_numbers = #tpu.dot_dimension_numbers<[1], [0], [0], [1], [0, 0, 1, 1], [], []>} : vector<16x8xf32>, vector<8x128xf32>, vector<16x128xf32> -> vector<16x128xf32>
    %52 = vector.extract_strided_slice %11 {offsets = [0, 8], sizes = [16, 8], strides = [1, 1]} : vector<16x32xf32> to vector<16x8xf32>
    %cst_19 = arith.constant -1.000000e+30 : f32
    %53 = vector.broadcast %cst_19 : f32 to vector<16x1xf32>
    %cst_20 = arith.constant 0.000000e+00 : f32
    %54 = vector.broadcast %cst_20 : f32 to vector<16x1xf32>
    %cst_21 = arith.constant 0.000000e+00 : f32
    %55 = vector.broadcast %cst_21 : f32 to vector<16x8xf32>
    %c0_i32_22 = arith.constant 0 : i32
    %56 = arith.subi %arg1, %c0_i32_22 : i32
    %57 = arith.addi %c0_i32_22, %56 : i32
    %c1_i32_23 = arith.constant 1 : i32
    %58:3 = scf.for %arg8 = %c0_i32_22 to %57 step %c1_i32_23 iter_args(%arg9 = %53, %arg10 = %54, %arg11 = %55) -> (vector<16x1xf32>, vector<16x1xf32>, vector<16x8xf32>)  : i32 {
      %c16_i32_58 = arith.constant 16 : i32
      %160 = arith.muli %arg8, %c16_i32_58 : i32
      %161 = tpu.assume_multiple %160, 16 : i32
      %162 = arith.index_cast %161 : i32 to index
      %c8_59 = arith.constant 8 : index
      %163 = vector.load %arg7[%162, %c8_59] : memref<16x64xf32, #tpu.memory_space<vmem>>, vector<16x8xf32>
      %164 = arith.index_cast %161 : i32 to index
      %c40_60 = arith.constant 40 : index
      %165 = vector.load %arg7[%164, %c40_60] : memref<16x64xf32, #tpu.memory_space<vmem>>, vector<16x8xf32>
      %cst_61 = arith.constant dense<0.000000e+00> : vector<16x16xf32>
      %166 = tpu.matmul %52, %163, %cst_61 {dimension_numbers = #tpu.dot_dimension_numbers<[1], [1], [0], [0], [0, 0, 1, 0], [], []>} : vector<16x8xf32>, vector<16x8xf32>, vector<16x16xf32> -> vector<16x16xf32>
      %cst_62 = arith.constant dense<0xFF800000> : vector<16xf32>
      %167 = vector.multi_reduction <maximumf>, %166, %cst_62 [1] : vector<16x16xf32> to vector<16xf32>
      %168 = vector.shape_cast %167 : vector<16xf32> to vector<16x1xf32>
      %169 = arith.maximumf %arg9, %168 : vector<16x1xf32>
      %170 = arith.subf %arg9, %169 : vector<16x1xf32>
      %171 = math.exp %170 : vector<16x1xf32>
      %172 = vector.broadcast %169 : vector<16x1xf32> to vector<16x16xf32>
      %173 = arith.subf %166, %172 : vector<16x16xf32>
      %174 = math.exp %173 : vector<16x16xf32>
      %175 = arith.mulf %171, %arg10 : vector<16x1xf32>
      %cst_63 = arith.constant dense<0.000000e+00> : vector<16xf32>
      %176 = vector.multi_reduction <add>, %174, %cst_63 [1] : vector<16x16xf32> to vector<16xf32>
      %177 = vector.shape_cast %176 : vector<16xf32> to vector<16x1xf32>
      %178 = arith.addf %175, %177 : vector<16x1xf32>
      %cst_64 = arith.constant dense<0.000000e+00> : vector<16x8xf32>
      %179 = tpu.matmul %174, %165, %cst_64 {dimension_numbers = #tpu.dot_dimension_numbers<[1], [0], [0], [1], [0, 0, 1, 1], [], []>} : vector<16x16xf32>, vector<16x8xf32>, vector<16x8xf32> -> vector<16x8xf32>
      %180 = vector.broadcast %171 : vector<16x1xf32> to vector<16x8xf32>
      %181 = arith.mulf %180, %arg11 : vector<16x8xf32>
      %182 = arith.addf %181, %179 : vector<16x8xf32>
      scf.yield %169, %178, %182 : vector<16x1xf32>, vector<16x1xf32>, vector<16x8xf32>
    }
    %59 = arith.index_cast %4 : i32 to index
    %c8 = arith.constant 8 : index
    %60 = vector.load %arg7[%59, %c8] : memref<16x64xf32, #tpu.memory_space<vmem>>, vector<16x8xf32>
    %61 = arith.index_cast %4 : i32 to index
    %c40 = arith.constant 40 : index
    %62 = vector.load %arg7[%61, %c40] : memref<16x64xf32, #tpu.memory_space<vmem>>, vector<16x8xf32>
    %cst_24 = arith.constant dense<0.000000e+00> : vector<16x16xf32>
    %63 = tpu.matmul %52, %60, %cst_24 {dimension_numbers = #tpu.dot_dimension_numbers<[1], [1], [0], [0], [0, 0, 1, 0], [], []>} : vector<16x8xf32>, vector<16x8xf32>, vector<16x16xf32> -> vector<16x16xf32>
    %64 = arith.addf %63, %17 : vector<16x16xf32>
    %cst_25 = arith.constant dense<0xFF800000> : vector<16xf32>
    %65 = vector.multi_reduction <maximumf>, %64, %cst_25 [1] : vector<16x16xf32> to vector<16xf32>
    %66 = vector.shape_cast %65 : vector<16xf32> to vector<16x1xf32>
    %67 = arith.maximumf %58#0, %66 : vector<16x1xf32>
    %68 = arith.subf %58#0, %67 : vector<16x1xf32>
    %69 = math.exp %68 : vector<16x1xf32>
    %70 = vector.broadcast %67 : vector<16x1xf32> to vector<16x16xf32>
    %71 = arith.subf %64, %70 : vector<16x16xf32>
    %72 = math.exp %71 : vector<16x16xf32>
    %73 = arith.mulf %69, %58#1 : vector<16x1xf32>
    %cst_26 = arith.constant dense<0.000000e+00> : vector<16xf32>
    %74 = vector.multi_reduction <add>, %72, %cst_26 [1] : vector<16x16xf32> to vector<16xf32>
    %75 = vector.shape_cast %74 : vector<16xf32> to vector<16x1xf32>
    %76 = arith.addf %73, %75 : vector<16x1xf32>
    %77 = vector.broadcast %69 : vector<16x1xf32> to vector<16x8xf32>
    %78 = arith.mulf %77, %58#2 : vector<16x8xf32>
    %cst_27 = arith.constant dense<0.000000e+00> : vector<16x8xf32>
    %79 = tpu.matmul %72, %62, %cst_27 {dimension_numbers = #tpu.dot_dimension_numbers<[1], [0], [0], [1], [0, 0, 1, 1], [], []>} : vector<16x16xf32>, vector<16x8xf32>, vector<16x8xf32> -> vector<16x8xf32>
    %80 = arith.addf %78, %79 : vector<16x8xf32>
    %81 = tpu.reciprocal %76 {approx = true} : vector<16x1xf32> -> vector<16x1xf32>
    %82 = vector.broadcast %81 : vector<16x1xf32> to vector<16x8xf32>
    %83 = arith.mulf %80, %82 : vector<16x8xf32>
    %c8_28 = arith.constant 8 : index
    %c0_29 = arith.constant 0 : index
    %84 = vector.load %arg5[%c8_28, %c0_29] : memref<32x128xf32, #tpu.memory_space<vmem>>, vector<8x128xf32>
    %cst_30 = arith.constant dense<0.000000e+00> : vector<16x128xf32>
    %85 = tpu.matmul %83, %84, %cst_30 {dimension_numbers = #tpu.dot_dimension_numbers<[1], [0], [0], [1], [0, 0, 1, 1], [], []>} : vector<16x8xf32>, vector<8x128xf32>, vector<16x128xf32> -> vector<16x128xf32>
    %86 = arith.addf %51, %85 : vector<16x128xf32>
    %87 = vector.extract_strided_slice %11 {offsets = [0, 16], sizes = [16, 8], strides = [1, 1]} : vector<16x32xf32> to vector<16x8xf32>
    %cst_31 = arith.constant -1.000000e+30 : f32
    %88 = vector.broadcast %cst_31 : f32 to vector<16x1xf32>
    %cst_32 = arith.constant 0.000000e+00 : f32
    %89 = vector.broadcast %cst_32 : f32 to vector<16x1xf32>
    %cst_33 = arith.constant 0.000000e+00 : f32
    %90 = vector.broadcast %cst_33 : f32 to vector<16x8xf32>
    %c0_i32_34 = arith.constant 0 : i32
    %91 = arith.subi %arg1, %c0_i32_34 : i32
    %92 = arith.addi %c0_i32_34, %91 : i32
    %c1_i32_35 = arith.constant 1 : i32
    %93:3 = scf.for %arg8 = %c0_i32_34 to %92 step %c1_i32_35 iter_args(%arg9 = %88, %arg10 = %89, %arg11 = %90) -> (vector<16x1xf32>, vector<16x1xf32>, vector<16x8xf32>)  : i32 {
      %c16_i32_58 = arith.constant 16 : i32
      %160 = arith.muli %arg8, %c16_i32_58 : i32
      %161 = tpu.assume_multiple %160, 16 : i32
      %162 = arith.index_cast %161 : i32 to index
      %c16_59 = arith.constant 16 : index
      %163 = vector.load %arg7[%162, %c16_59] : memref<16x64xf32, #tpu.memory_space<vmem>>, vector<16x8xf32>
      %164 = arith.index_cast %161 : i32 to index
      %c48_60 = arith.constant 48 : index
      %165 = vector.load %arg7[%164, %c48_60] : memref<16x64xf32, #tpu.memory_space<vmem>>, vector<16x8xf32>
      %cst_61 = arith.constant dense<0.000000e+00> : vector<16x16xf32>
      %166 = tpu.matmul %87, %163, %cst_61 {dimension_numbers = #tpu.dot_dimension_numbers<[1], [1], [0], [0], [0, 0, 1, 0], [], []>} : vector<16x8xf32>, vector<16x8xf32>, vector<16x16xf32> -> vector<16x16xf32>
      %cst_62 = arith.constant dense<0xFF800000> : vector<16xf32>
      %167 = vector.multi_reduction <maximumf>, %166, %cst_62 [1] : vector<16x16xf32> to vector<16xf32>
      %168 = vector.shape_cast %167 : vector<16xf32> to vector<16x1xf32>
      %169 = arith.maximumf %arg9, %168 : vector<16x1xf32>
      %170 = arith.subf %arg9, %169 : vector<16x1xf32>
      %171 = math.exp %170 : vector<16x1xf32>
      %172 = vector.broadcast %169 : vector<16x1xf32> to vector<16x16xf32>
      %173 = arith.subf %166, %172 : vector<16x16xf32>
      %174 = math.exp %173 : vector<16x16xf32>
      %175 = arith.mulf %171, %arg10 : vector<16x1xf32>
      %cst_63 = arith.constant dense<0.000000e+00> : vector<16xf32>
      %176 = vector.multi_reduction <add>, %174, %cst_63 [1] : vector<16x16xf32> to vector<16xf32>
      %177 = vector.shape_cast %176 : vector<16xf32> to vector<16x1xf32>
      %178 = arith.addf %175, %177 : vector<16x1xf32>
      %cst_64 = arith.constant dense<0.000000e+00> : vector<16x8xf32>
      %179 = tpu.matmul %174, %165, %cst_64 {dimension_numbers = #tpu.dot_dimension_numbers<[1], [0], [0], [1], [0, 0, 1, 1], [], []>} : vector<16x16xf32>, vector<16x8xf32>, vector<16x8xf32> -> vector<16x8xf32>
      %180 = vector.broadcast %171 : vector<16x1xf32> to vector<16x8xf32>
      %181 = arith.mulf %180, %arg11 : vector<16x8xf32>
      %182 = arith.addf %181, %179 : vector<16x8xf32>
      scf.yield %169, %178, %182 : vector<16x1xf32>, vector<16x1xf32>, vector<16x8xf32>
    }
    %94 = arith.index_cast %4 : i32 to index
    %c16 = arith.constant 16 : index
    %95 = vector.load %arg7[%94, %c16] : memref<16x64xf32, #tpu.memory_space<vmem>>, vector<16x8xf32>
    %96 = arith.index_cast %4 : i32 to index
    %c48 = arith.constant 48 : index
    %97 = vector.load %arg7[%96, %c48] : memref<16x64xf32, #tpu.memory_space<vmem>>, vector<16x8xf32>
    %cst_36 = arith.constant dense<0.000000e+00> : vector<16x16xf32>
    %98 = tpu.matmul %87, %95, %cst_36 {dimension_numbers = #tpu.dot_dimension_numbers<[1], [1], [0], [0], [0, 0, 1, 0], [], []>} : vector<16x8xf32>, vector<16x8xf32>, vector<16x16xf32> -> vector<16x16xf32>
    %99 = arith.addf %98, %17 : vector<16x16xf32>
    %cst_37 = arith.constant dense<0xFF800000> : vector<16xf32>
    %100 = vector.multi_reduction <maximumf>, %99, %cst_37 [1] : vector<16x16xf32> to vector<16xf32>
    %101 = vector.shape_cast %100 : vector<16xf32> to vector<16x1xf32>
    %102 = arith.maximumf %93#0, %101 : vector<16x1xf32>
    %103 = arith.subf %93#0, %102 : vector<16x1xf32>
    %104 = math.exp %103 : vector<16x1xf32>
    %105 = vector.broadcast %102 : vector<16x1xf32> to vector<16x16xf32>
    %106 = arith.subf %99, %105 : vector<16x16xf32>
    %107 = math.exp %106 : vector<16x16xf32>
    %108 = arith.mulf %104, %93#1 : vector<16x1xf32>
    %cst_38 = arith.constant dense<0.000000e+00> : vector<16xf32>
    %109 = vector.multi_reduction <add>, %107, %cst_38 [1] : vector<16x16xf32> to vector<16xf32>
    %110 = vector.shape_cast %109 : vector<16xf32> to vector<16x1xf32>
    %111 = arith.addf %108, %110 : vector<16x1xf32>
    %112 = vector.broadcast %104 : vector<16x1xf32> to vector<16x8xf32>
    %113 = arith.mulf %112, %93#2 : vector<16x8xf32>
    %cst_39 = arith.constant dense<0.000000e+00> : vector<16x8xf32>
    %114 = tpu.matmul %107, %97, %cst_39 {dimension_numbers = #tpu.dot_dimension_numbers<[1], [0], [0], [1], [0, 0, 1, 1], [], []>} : vector<16x16xf32>, vector<16x8xf32>, vector<16x8xf32> -> vector<16x8xf32>
    %115 = arith.addf %113, %114 : vector<16x8xf32>
    %116 = tpu.reciprocal %111 {approx = true} : vector<16x1xf32> -> vector<16x1xf32>
    %117 = vector.broadcast %116 : vector<16x1xf32> to vector<16x8xf32>
    %118 = arith.mulf %115, %117 : vector<16x8xf32>
    %c16_40 = arith.constant 16 : index
    %c0_41 = arith.constant 0 : index
    %119 = vector.load %arg5[%c16_40, %c0_41] : memref<32x128xf32, #tpu.memory_space<vmem>>, vector<8x128xf32>
    %cst_42 = arith.constant dense<0.000000e+00> : vector<16x128xf32>
    %120 = tpu.matmul %118, %119, %cst_42 {dimension_numbers = #tpu.dot_dimension_numbers<[1], [0], [0], [1], [0, 0, 1, 1], [], []>} : vector<16x8xf32>, vector<8x128xf32>, vector<16x128xf32> -> vector<16x128xf32>
    %121 = arith.addf %86, %120 : vector<16x128xf32>
    %122 = vector.extract_strided_slice %11 {offsets = [0, 24], sizes = [16, 8], strides = [1, 1]} : vector<16x32xf32> to vector<16x8xf32>
    %cst_43 = arith.constant -1.000000e+30 : f32
    %123 = vector.broadcast %cst_43 : f32 to vector<16x1xf32>
    %cst_44 = arith.constant 0.000000e+00 : f32
    %124 = vector.broadcast %cst_44 : f32 to vector<16x1xf32>
    %cst_45 = arith.constant 0.000000e+00 : f32
    %125 = vector.broadcast %cst_45 : f32 to vector<16x8xf32>
    %c0_i32_46 = arith.constant 0 : i32
    %126 = arith.subi %arg1, %c0_i32_46 : i32
    %127 = arith.addi %c0_i32_46, %126 : i32
    %c1_i32_47 = arith.constant 1 : i32
    %128:3 = scf.for %arg8 = %c0_i32_46 to %127 step %c1_i32_47 iter_args(%arg9 = %123, %arg10 = %124, %arg11 = %125) -> (vector<16x1xf32>, vector<16x1xf32>, vector<16x8xf32>)  : i32 {
      %c16_i32_58 = arith.constant 16 : i32
      %160 = arith.muli %arg8, %c16_i32_58 : i32
      %161 = tpu.assume_multiple %160, 16 : i32
      %162 = arith.index_cast %161 : i32 to index
      %c24_59 = arith.constant 24 : index
      %163 = vector.load %arg7[%162, %c24_59] : memref<16x64xf32, #tpu.memory_space<vmem>>, vector<16x8xf32>
      %164 = arith.index_cast %161 : i32 to index
      %c56_60 = arith.constant 56 : index
      %165 = vector.load %arg7[%164, %c56_60] : memref<16x64xf32, #tpu.memory_space<vmem>>, vector<16x8xf32>
      %cst_61 = arith.constant dense<0.000000e+00> : vector<16x16xf32>
      %166 = tpu.matmul %122, %163, %cst_61 {dimension_numbers = #tpu.dot_dimension_numbers<[1], [1], [0], [0], [0, 0, 1, 0], [], []>} : vector<16x8xf32>, vector<16x8xf32>, vector<16x16xf32> -> vector<16x16xf32>
      %cst_62 = arith.constant dense<0xFF800000> : vector<16xf32>
      %167 = vector.multi_reduction <maximumf>, %166, %cst_62 [1] : vector<16x16xf32> to vector<16xf32>
      %168 = vector.shape_cast %167 : vector<16xf32> to vector<16x1xf32>
      %169 = arith.maximumf %arg9, %168 : vector<16x1xf32>
      %170 = arith.subf %arg9, %169 : vector<16x1xf32>
      %171 = math.exp %170 : vector<16x1xf32>
      %172 = vector.broadcast %169 : vector<16x1xf32> to vector<16x16xf32>
      %173 = arith.subf %166, %172 : vector<16x16xf32>
      %174 = math.exp %173 : vector<16x16xf32>
      %175 = arith.mulf %171, %arg10 : vector<16x1xf32>
      %cst_63 = arith.constant dense<0.000000e+00> : vector<16xf32>
      %176 = vector.multi_reduction <add>, %174, %cst_63 [1] : vector<16x16xf32> to vector<16xf32>
      %177 = vector.shape_cast %176 : vector<16xf32> to vector<16x1xf32>
      %178 = arith.addf %175, %177 : vector<16x1xf32>
      %cst_64 = arith.constant dense<0.000000e+00> : vector<16x8xf32>
      %179 = tpu.matmul %174, %165, %cst_64 {dimension_numbers = #tpu.dot_dimension_numbers<[1], [0], [0], [1], [0, 0, 1, 1], [], []>} : vector<16x16xf32>, vector<16x8xf32>, vector<16x8xf32> -> vector<16x8xf32>
      %180 = vector.broadcast %171 : vector<16x1xf32> to vector<16x8xf32>
      %181 = arith.mulf %180, %arg11 : vector<16x8xf32>
      %182 = arith.addf %181, %179 : vector<16x8xf32>
      scf.yield %169, %178, %182 : vector<16x1xf32>, vector<16x1xf32>, vector<16x8xf32>
    }
    %129 = arith.index_cast %4 : i32 to index
    %c24 = arith.constant 24 : index
    %130 = vector.load %arg7[%129, %c24] : memref<16x64xf32, #tpu.memory_space<vmem>>, vector<16x8xf32>
    %131 = arith.index_cast %4 : i32 to index
    %c56 = arith.constant 56 : index
    %132 = vector.load %arg7[%131, %c56] : memref<16x64xf32, #tpu.memory_space<vmem>>, vector<16x8xf32>
    %cst_48 = arith.constant dense<0.000000e+00> : vector<16x16xf32>
    %133 = tpu.matmul %122, %130, %cst_48 {dimension_numbers = #tpu.dot_dimension_numbers<[1], [1], [0], [0], [0, 0, 1, 0], [], []>} : vector<16x8xf32>, vector<16x8xf32>, vector<16x16xf32> -> vector<16x16xf32>
    %134 = arith.addf %133, %17 : vector<16x16xf32>
    %cst_49 = arith.constant dense<0xFF800000> : vector<16xf32>
    %135 = vector.multi_reduction <maximumf>, %134, %cst_49 [1] : vector<16x16xf32> to vector<16xf32>
    %136 = vector.shape_cast %135 : vector<16xf32> to vector<16x1xf32>
    %137 = arith.maximumf %128#0, %136 : vector<16x1xf32>
    %138 = arith.subf %128#0, %137 : vector<16x1xf32>
    %139 = math.exp %138 : vector<16x1xf32>
    %140 = vector.broadcast %137 : vector<16x1xf32> to vector<16x16xf32>
    %141 = arith.subf %134, %140 : vector<16x16xf32>
    %142 = math.exp %141 : vector<16x16xf32>
    %143 = arith.mulf %139, %128#1 : vector<16x1xf32>
    %cst_50 = arith.constant dense<0.000000e+00> : vector<16xf32>
    %144 = vector.multi_reduction <add>, %142, %cst_50 [1] : vector<16x16xf32> to vector<16xf32>
    %145 = vector.shape_cast %144 : vector<16xf32> to vector<16x1xf32>
    %146 = arith.addf %143, %145 : vector<16x1xf32>
    %147 = vector.broadcast %139 : vector<16x1xf32> to vector<16x8xf32>
    %148 = arith.mulf %147, %128#2 : vector<16x8xf32>
    %cst_51 = arith.constant dense<0.000000e+00> : vector<16x8xf32>
    %149 = tpu.matmul %142, %132, %cst_51 {dimension_numbers = #tpu.dot_dimension_numbers<[1], [0], [0], [1], [0, 0, 1, 1], [], []>} : vector<16x16xf32>, vector<16x8xf32>, vector<16x8xf32> -> vector<16x8xf32>
    %150 = arith.addf %148, %149 : vector<16x8xf32>
    %151 = tpu.reciprocal %146 {approx = true} : vector<16x1xf32> -> vector<16x1xf32>
    %152 = vector.broadcast %151 : vector<16x1xf32> to vector<16x8xf32>
    %153 = arith.mulf %150, %152 : vector<16x8xf32>
    %c24_52 = arith.constant 24 : index
    %c0_53 = arith.constant 0 : index
    %154 = vector.load %arg5[%c24_52, %c0_53] : memref<32x128xf32, #tpu.memory_space<vmem>>, vector<8x128xf32>
    %cst_54 = arith.constant dense<0.000000e+00> : vector<16x128xf32>
    %155 = tpu.matmul %153, %154, %cst_54 {dimension_numbers = #tpu.dot_dimension_numbers<[1], [0], [0], [1], [0, 0, 1, 1], [], []>} : vector<16x8xf32>, vector<8x128xf32>, vector<16x128xf32> -> vector<16x128xf32>
    %156 = arith.addf %121, %155 : vector<16x128xf32>
    %c0_55 = arith.constant 0 : index
    %c0_56 = arith.constant 0 : index
    %c0_57 = arith.constant 0 : index
    %157 = vector.load %arg6[%c0_55, %c0_56, %c0_57] : memref<1x16x128xf32, #tpu.memory_space<vmem>>, vector<1x16x128xf32>
    %158 = vector.shape_cast %157 : vector<1x16x128xf32> to vector<16x128xf32>
    %159 = vector.shape_cast %156 : vector<16x128xf32> to vector<1x16x128xf32>
    tpu.vector_store %arg6[%c0_55, %c0_56, %c0_57], %159 {strides = array<i32>} : memref<1x16x128xf32, #tpu.memory_space<vmem>>, vector<1x16x128xf32>,
    return
  }
  func.func @transform_0(%arg0: i32, %arg1: i32) -> (i32, i32, i32) {
    %c0_i32 = arith.constant 0 : i32
    %c0_i32_0 = arith.constant 0 : i32
    %c0_i32_1 = arith.constant 0 : i32
    return %arg0, %c0_i32, %c0_i32_0 : i32, i32, i32
  }
  func.func @transform_1(%arg0: i32, %arg1: i32) -> (i32, i32) {
    %c0_i32 = arith.constant 0 : i32
    %c0_i32_0 = arith.constant 0 : i32
    %c0_i32_1 = arith.constant 0 : i32
    return %c0_i32, %c0_i32_0 : i32, i32
  }
  func.func @transform_2(%arg0: i32, %arg1: i32) -> (i32, i32) {
    %c0_i32 = arith.constant 0 : i32
    %c0_i32_0 = arith.constant 0 : i32
    %c0_i32_1 = arith.constant 0 : i32
    return %c0_i32, %c0_i32_0 : i32, i32
  }
  func.func @transform_3(%arg0: i32, %arg1: i32) -> (i32, i32) {
    %c0_i32 = arith.constant 0 : i32
    %c0_i32_0 = arith.constant 0 : i32
    %c0_i32_1 = arith.constant 0 : i32
    return %c0_i32, %c0_i32_0 : i32, i32
  }
  func.func @transform_4(%arg0: i32, %arg1: i32) -> (i32, i32, i32) {
    %c0_i32 = arith.constant 0 : i32
    %c0_i32_0 = arith.constant 0 : i32
    return %arg0, %arg1, %c0_i32 : i32, i32, i32
  }
}

module attributes {stable_mosaic.version = 11 : i64} {
  func.func @_mhsa_kernel(%arg0: i32, %arg1: i32, %arg2: memref<1x16x32xf32, #tpu.memory_space<vmem>>, %arg3: memref<32x32xf32, #tpu.memory_space<vmem>>, %arg4: memref<32x64xf32, #tpu.memory_space<vmem>>, %arg5: memref<32x128xf32, #tpu.memory_space<vmem>>, %arg6: memref<1x16x128xf32, #tpu.memory_space<vmem>>, %arg7: memref<16x64xf32, #tpu.memory_space<vmem>>) attributes {dimension_semantics = [#tpu.dimension_semantics<parallel>, #tpu.dimension_semantics<arbitrary>], iteration_bounds = array<i64: 2, 1>, scalar_prefetch = 0 : i64, scratch_operands = 1 : i64, tpu.core_type = #tpu.core_type<tc>, window_params = [{transform_indices = @transform_0, window_bounds = array<i64: 1, 16, 32>}, {pipeline_mode = #tpu.pipeline_mode<synchronous>, transform_indices = @transform_1, window_bounds = array<i64: 32, 32>}, {pipeline_mode = #tpu.pipeline_mode<synchronous>, transform_indices = @transform_2, window_bounds = array<i64: 32, 64>}, {pipeline_mode = #tpu.pipeline_mode<synchronous>, transform_indices = @transform_3, window_bounds = array<i64: 32, 128>}, {transform_indices = @transform_4, window_bounds = array<i64: 1, 16, 128>}]} {
    %c0_i32 = arith.constant 0 : i32
    %0 = arith.cmpi eq, %arg1, %c0_i32 : i32
    %1 = arith.extui %0 : i1 to i32
    %c0_i32_0 = arith.constant 0 : i32
    %2 = arith.cmpi ne, %1, %c0_i32_0 : i32
    scf.if %2 {
      %c0_i32_58 = arith.constant 0 : i32
      %c1_i32_59 = arith.constant 1 : i32
      %160 = arith.muli %c0_i32_58, %c1_i32_59 : i32
      %c0_i32_60 = arith.constant 0 : i32
      %161 = arith.addi %c0_i32_60, %160 : i32
      %c16_i32_61 = arith.constant 16 : i32
      %162 = arith.muli %161, %c16_i32_61 : i32
      %163 = tpu.assume_multiple %162, 16 : i32
      %c0_62 = arith.constant 0 : index
      %164 = arith.index_cast %163 : i32 to index
      %c0_63 = arith.constant 0 : index
      %165 = vector.load %arg2[%c0_62, %164, %c0_63] : memref<1x16x32xf32, #tpu.memory_space<vmem>>, vector<1x16x32xf32>
      %166 = vector.shape_cast %165 : vector<1x16x32xf32> to vector<16x32xf32>
      %c0_64 = arith.constant 0 : index
      %c0_65 = arith.constant 0 : index
      %167 = vector.load %arg4[%c0_64, %c0_65] : memref<32x64xf32, #tpu.memory_space<vmem>>, vector<32x64xf32>
      %cst_66 = arith.constant dense<0.000000e+00> : vector<16x64xf32>
      %168 = tpu.matmul %166, %167, %cst_66 {dimension_numbers = #tpu.dot_dimension_numbers<[1], [0], [0], [1], [0, 0, 1, 1], [], []>} : vector<16x32xf32>, vector<32x64xf32>, vector<16x64xf32> -> vector<16x64xf32>
      %169 = arith.index_cast %163 : i32 to index
      %c0_67 = arith.constant 0 : index
      %170 = vector.load %arg7[%169, %c0_67] : memref<16x64xf32, #tpu.memory_space<vmem>>, vector<16x64xf32>
      tpu.vector_store %arg7[%169, %c0_67], %168 {strides = array<i32>} : memref<16x64xf32, #tpu.memory_space<vmem>>, vector<16x64xf32>,
      %c1_i32_68 = arith.constant 1 : i32
    } else {
    }
    %c16_i32 = arith.constant 16 : i32
    %3 = arith.muli %arg1, %c16_i32 : i32
    %4 = tpu.assume_multiple %3, 16 : i32
    %c0 = arith.constant 0 : index
    %5 = arith.index_cast %4 : i32 to index
    %c0_1 = arith.constant 0 : index
    %6 = vector.load %arg2[%c0, %5, %c0_1] : memref<1x16x32xf32, #tpu.memory_space<vmem>>, vector<1x16x32xf32>
    %7 = vector.shape_cast %6 : vector<1x16x32xf32> to vector<16x32xf32>
    %c0_2 = arith.constant 0 : index
    %c0_3 = arith.constant 0 : index
    %8 = vector.load %arg3[%c0_2, %c0_3] : memref<32x32xf32, #tpu.memory_space<vmem>>, vector<32x32xf32>
    %cst = arith.constant dense<0.000000e+00> : vector<16x32xf32>
    %9 = tpu.matmul %7, %8, %cst {dimension_numbers = #tpu.dot_dimension_numbers<[1], [0], [0], [1], [0, 0, 1, 1], [], []>} : vector<16x32xf32>, vector<32x32xf32>, vector<16x32xf32> -> vector<16x32xf32>
    %cst_4 = arith.constant 0.353553385 : f32
    %10 = vector.broadcast %cst_4 : f32 to vector<16x32xf32>
    %11 = arith.mulf %9, %10 : vector<16x32xf32>
    %12 = tpu.iota {dimensions = array<i32: 0>} : vector<16x16xi32>
    %13 = tpu.iota {dimensions = array<i32: 1>} : vector<16x16xi32>
    %14 = arith.cmpi sgt, %13, %12 : vector<16x16xi32>
    %cst_5 = arith.constant -1.000000e+30 : f32
    %cst_6 = arith.constant 0.000000e+00 : f32
    %15 = vector.broadcast %cst_5 : f32 to vector<16x16xf32>
    %16 = vector.broadcast %cst_6 : f32 to vector<16x16xf32>
    %17 = arith.select %14, %15, %16 : vector<16x16xi1>, vector<16x16xf32>
    %18 = vector.extract_strided_slice %11 {offsets = [0, 0], sizes = [16, 8], strides = [1, 1]} : vector<16x32xf32> to vector<16x8xf32>
    %cst_7 = arith.constant -1.000000e+30 : f32
    %19 = vector.broadcast %cst_7 : f32 to vector<16x1xf32>
    %cst_8 = arith.constant 0.000000e+00 : f32
    %20 = vector.broadcast %cst_8 : f32 to vector<16x1xf32>
    %cst_9 = arith.constant 0.000000e+00 : f32
    %21 = vector.broadcast %cst_9 : f32 to vector<16x8xf32>
    %c0_i32_10 = arith.constant 0 : i32
    %22 = arith.subi %arg1, %c0_i32_10 : i32
    %23 = arith.addi %c0_i32_10, %22 : i32
    %c1_i32 = arith.constant 1 : i32
    %24:3 = scf.for %arg8 = %c0_i32_10 to %23 step %c1_i32 iter_args(%arg9 = %19, %arg10 = %20, %arg11 = %21) -> (vector<16x1xf32>, vector<16x1xf32>, vector<16x8xf32>)  : i32 {
      %c16_i32_58 = arith.constant 16 : i32
      %160 = arith.muli %arg8, %c16_i32_58 : i32
      %161 = tpu.assume_multiple %160, 16 : i32
      %162 = arith.index_cast %161 : i32 to index
      %c0_59 = arith.constant 0 : index
      %163 = vector.load %arg7[%162, %c0_59] : memref<16x64xf32, #tpu.memory_space<vmem>>, vector<16x8xf32>
      %164 = arith.index_cast %161 : i32 to index
      %c32_60 = arith.constant 32 : index
      %165 = vector.load %arg7[%164, %c32_60] : memref<16x64xf32, #tpu.memory_space<vmem>>, vector<16x8xf32>
      %cst_61 = arith.constant dense<0.000000e+00> : vector<16x16xf32>
      %166 = tpu.matmul %18, %163, %cst_61 {dimension_numbers = #tpu.dot_dimension_numbers<[1], [1], [0], [0], [0, 0, 1, 0], [], []>} : vector<16x8xf32>, vector<16x8xf32>, vector<16x16xf32> -> vector<16x16xf32>
      %cst_62 = arith.constant dense<0xFF800000> : vector<16xf32>
      %167 = vector.multi_reduction <maximumf>, %166, %cst_62 [1] : vector<16x16xf32> to vector<16xf32>
      %168 = vector.shape_cast %167 : vector<16xf32> to vector<16x1xf32>
      %169 = arith.maximumf %arg9, %168 : vector<16x1xf32>
      %170 = arith.subf %arg9, %169 : vector<16x1xf32>
      %171 = math.exp %170 : vector<16x1xf32>
      %172 = vector.broadcast %169 : vector<16x1xf32> to vector<16x16xf32>
      %173 = arith.subf %166, %172 : vector<16x16xf32>
      %174 = math.exp %173 : vector<16x16xf32>
      %175 = arith.mulf %171, %arg10 : vector<16x1xf32>
      %cst_63 = arith.constant dense<0.000000e+00> : vector<16xf32>
      %176 = vector.multi_reduction <add>, %174, %cst_63 [1] : vector<16x16xf32> to vector<16xf32>
      %177 = vector.shape_cast %176 : vector<16xf32> to vector<16x1xf32>
      %178 = arith.addf %175, %177 : vector<16x1xf32>
      %cst_64 = arith.constant dense<0.000000e+00> : vector<16x8xf32>
      %179 = tpu.matmul %174, %165, %cst_64 {dimension_numbers = #tpu.dot_dimension_numbers<[1], [0], [0], [1], [0, 0, 1, 1], [], []>} : vector<16x16xf32>, vector<16x8xf32>, vector<16x8xf32> -> vector<16x8xf32>
      %180 = vector.broadcast %171 : vector<16x1xf32> to vector<16x8xf32>
      %181 = arith.mulf %180, %arg11 : vector<16x8xf32>
      %182 = arith.addf %181, %179 : vector<16x8xf32>
      scf.yield %169, %178, %182 : vector<16x1xf32>, vector<16x1xf32>, vector<16x8xf32>
    }
    %25 = arith.index_cast %4 : i32 to index
    %c0_11 = arith.constant 0 : index
    %26 = vector.load %arg7[%25, %c0_11] : memref<16x64xf32, #tpu.memory_space<vmem>>, vector<16x8xf32>
    %27 = arith.index_cast %4 : i32 to index
    %c32 = arith.constant 32 : index
    %28 = vector.load %arg7[%27, %c32] : memref<16x64xf32, #tpu.memory_space<vmem>>, vector<16x8xf32>
    %cst_12 = arith.constant dense<0.000000e+00> : vector<16x16xf32>
    %29 = tpu.matmul %18, %26, %cst_12 {dimension_numbers = #tpu.dot_dimension_numbers<[1], [1], [0], [0], [0, 0, 1, 0], [], []>} : vector<16x8xf32>, vector<16x8xf32>, vector<16x16xf32> -> vector<16x16xf32>
    %30 = arith.addf %29, %17 : vector<16x16xf32>
    %cst_13 = arith.constant dense<0xFF800000> : vector<16xf32>
    %31 = vector.multi_reduction <maximumf>, %30, %cst_13 [1] : vector<16x16xf32> to vector<16xf32>
    %32 = vector.shape_cast %31 : vector<16xf32> to vector<16x1xf32>
    %33 = arith.maximumf %24#0, %32 : vector<16x1xf32>
    %34 = arith.subf %24#0, %33 : vector<16x1xf32>
    %35 = math.exp %34 : vector<16x1xf32>
    %36 = vector.broadcast %33 : vector<16x1xf32> to vector<16x16xf32>
    %37 = arith.subf %30, %36 : vector<16x16xf32>
    %38 = math.exp %37 : vector<16x16xf32>
    %39 = arith.mulf %35, %24#1 : vector<16x1xf32>
    %cst_14 = arith.constant dense<0.000000e+00> : vector<16xf32>
    %40 = vector.multi_reduction <add>, %38, %cst_14 [1] : vector<16x16xf32> to vector<16xf32>
    %41 = vector.shape_cast %40 : vector<16xf32> to vector<16x1xf32>
    %42 = arith.addf %39, %41 : vector<16x1xf32>
    %43 = vector.broadcast %35 : vector<16x1xf32> to vector<16x8xf32>
    %44 = arith.mulf %43, %24#2 : vector<16x8xf32>
    %cst_15 = arith.constant dense<0.000000e+00> : vector<16x8xf32>
    %45 = tpu.matmul %38, %28, %cst_15 {dimension_numbers = #tpu.dot_dimension_numbers<[1], [0], [0], [1], [0, 0, 1, 1], [], []>} : vector<16x16xf32>, vector<16x8xf32>, vector<16x8xf32> -> vector<16x8xf32>
    %46 = arith.addf %44, %45 : vector<16x8xf32>
    %47 = tpu.reciprocal %42 {approx = true} : vector<16x1xf32> -> vector<16x1xf32>
    %48 = vector.broadcast %47 : vector<16x1xf32> to vector<16x8xf32>
    %49 = arith.mulf %46, %48 : vector<16x8xf32>
    %c0_16 = arith.constant 0 : index
    %c0_17 = arith.constant 0 : index
    %50 = vector.load %arg5[%c0_16, %c0_17] : memref<32x128xf32, #tpu.memory_space<vmem>>, vector<8x128xf32>
    %cst_18 = arith.constant dense<0.000000e+00> : vector<16x128xf32>
    %51 = tpu.matmul %49, %50, %cst_18 {dimension_numbers = #tpu.dot_dimension_numbers<[1], [0], [0], [1], [0, 0, 1, 1], [], []>} : vector<16x8xf32>, vector<8x128xf32>, vector<16x128xf32> -> vector<16x128xf32>
    %52 = vector.extract_strided_slice %11 {offsets = [0, 8], sizes = [16, 8], strides = [1, 1]} : vector<16x32xf32> to vector<16x8xf32>
    %cst_19 = arith.constant -1.000000e+30 : f32
    %53 = vector.broadcast %cst_19 : f32 to vector<16x1xf32>
    %cst_20 = arith.constant 0.000000e+00 : f32
    %54 = vector.broadcast %cst_20 : f32 to vector<16x1xf32>
    %cst_21 = arith.constant 0.000000e+00 : f32
    %55 = vector.broadcast %cst_21 : f32 to vector<16x8xf32>
    %c0_i32_22 = arith.constant 0 : i32
    %56 = arith.subi %arg1, %c0_i32_22 : i32
    %57 = arith.addi %c0_i32_22, %56 : i32
    %c1_i32_23 = arith.constant 1 : i32
    %58:3 = scf.for %arg8 = %c0_i32_22 to %57 step %c1_i32_23 iter_args(%arg9 = %53, %arg10 = %54, %arg11 = %55) -> (vector<16x1xf32>, vector<16x1xf32>, vector<16x8xf32>)  : i32 {
      %c16_i32_58 = arith.constant 16 : i32
      %160 = arith.muli %arg8, %c16_i32_58 : i32
      %161 = tpu.assume_multiple %160, 16 : i32
      %162 = arith.index_cast %161 : i32 to index
      %c8_59 = arith.constant 8 : index
      %163 = vector.load %arg7[%162, %c8_59] : memref<16x64xf32, #tpu.memory_space<vmem>>, vector<16x8xf32>
      %164 = arith.index_cast %161 : i32 to index
      %c40_60 = arith.constant 40 : index
      %165 = vector.load %arg7[%164, %c40_60] : memref<16x64xf32, #tpu.memory_space<vmem>>, vector<16x8xf32>
      %cst_61 = arith.constant dense<0.000000e+00> : vector<16x16xf32>
      %166 = tpu.matmul %52, %163, %cst_61 {dimension_numbers = #tpu.dot_dimension_numbers<[1], [1], [0], [0], [0, 0, 1, 0], [], []>} : vector<16x8xf32>, vector<16x8xf32>, vector<16x16xf32> -> vector<16x16xf32>
      %cst_62 = arith.constant dense<0xFF800000> : vector<16xf32>
      %167 = vector.multi_reduction <maximumf>, %166, %cst_62 [1] : vector<16x16xf32> to vector<16xf32>
      %168 = vector.shape_cast %167 : vector<16xf32> to vector<16x1xf32>
      %169 = arith.maximumf %arg9, %168 : vector<16x1xf32>
      %170 = arith.subf %arg9, %169 : vector<16x1xf32>
      %171 = math.exp %170 : vector<16x1xf32>
      %172 = vector.broadcast %169 : vector<16x1xf32> to vector<16x16xf32>
      %173 = arith.subf %166, %172 : vector<16x16xf32>
      %174 = math.exp %173 : vector<16x16xf32>
      %175 = arith.mulf %171, %arg10 : vector<16x1xf32>
      %cst_63 = arith.constant dense<0.000000e+00> : vector<16xf32>
      %176 = vector.multi_reduction <add>, %174, %cst_63 [1] : vector<16x16xf32> to vector<16xf32>
      %177 = vector.shape_cast %176 : vector<16xf32> to vector<16x1xf32>
      %178 = arith.addf %175, %177 : vector<16x1xf32>
      %cst_64 = arith.constant dense<0.000000e+00> : vector<16x8xf32>
      %179 = tpu.matmul %174, %165, %cst_64 {dimension_numbers = #tpu.dot_dimension_numbers<[1], [0], [0], [1], [0, 0, 1, 1], [], []>} : vector<16x16xf32>, vector<16x8xf32>, vector<16x8xf32> -> vector<16x8xf32>
      %180 = vector.broadcast %171 : vector<16x1xf32> to vector<16x8xf32>
      %181 = arith.mulf %180, %arg11 : vector<16x8xf32>
      %182 = arith.addf %181, %179 : vector<16x8xf32>
      scf.yield %169, %178, %182 : vector<16x1xf32>, vector<16x1xf32>, vector<16x8xf32>
    }
    %59 = arith.index_cast %4 : i32 to index
    %c8 = arith.constant 8 : index
    %60 = vector.load %arg7[%59, %c8] : memref<16x64xf32, #tpu.memory_space<vmem>>, vector<16x8xf32>
    %61 = arith.index_cast %4 : i32 to index
    %c40 = arith.constant 40 : index
    %62 = vector.load %arg7[%61, %c40] : memref<16x64xf32, #tpu.memory_space<vmem>>, vector<16x8xf32>
    %cst_24 = arith.constant dense<0.000000e+00> : vector<16x16xf32>
    %63 = tpu.matmul %52, %60, %cst_24 {dimension_numbers = #tpu.dot_dimension_numbers<[1], [1], [0], [0], [0, 0, 1, 0], [], []>} : vector<16x8xf32>, vector<16x8xf32>, vector<16x16xf32> -> vector<16x16xf32>
    %64 = arith.addf %63, %17 : vector<16x16xf32>
    %cst_25 = arith.constant dense<0xFF800000> : vector<16xf32>
    %65 = vector.multi_reduction <maximumf>, %64, %cst_25 [1] : vector<16x16xf32> to vector<16xf32>
    %66 = vector.shape_cast %65 : vector<16xf32> to vector<16x1xf32>
    %67 = arith.maximumf %58#0, %66 : vector<16x1xf32>
    %68 = arith.subf %58#0, %67 : vector<16x1xf32>
    %69 = math.exp %68 : vector<16x1xf32>
    %70 = vector.broadcast %67 : vector<16x1xf32> to vector<16x16xf32>
    %71 = arith.subf %64, %70 : vector<16x16xf32>
    %72 = math.exp %71 : vector<16x16xf32>
    %73 = arith.mulf %69, %58#1 : vector<16x1xf32>
    %cst_26 = arith.constant dense<0.000000e+00> : vector<16xf32>
    %74 = vector.multi_reduction <add>, %72, %cst_26 [1] : vector<16x16xf32> to vector<16xf32>
    %75 = vector.shape_cast %74 : vector<16xf32> to vector<16x1xf32>
    %76 = arith.addf %73, %75 : vector<16x1xf32>
    %77 = vector.broadcast %69 : vector<16x1xf32> to vector<16x8xf32>
    %78 = arith.mulf %77, %58#2 : vector<16x8xf32>
    %cst_27 = arith.constant dense<0.000000e+00> : vector<16x8xf32>
    %79 = tpu.matmul %72, %62, %cst_27 {dimension_numbers = #tpu.dot_dimension_numbers<[1], [0], [0], [1], [0, 0, 1, 1], [], []>} : vector<16x16xf32>, vector<16x8xf32>, vector<16x8xf32> -> vector<16x8xf32>
    %80 = arith.addf %78, %79 : vector<16x8xf32>
    %81 = tpu.reciprocal %76 {approx = true} : vector<16x1xf32> -> vector<16x1xf32>
    %82 = vector.broadcast %81 : vector<16x1xf32> to vector<16x8xf32>
    %83 = arith.mulf %80, %82 : vector<16x8xf32>
    %c8_28 = arith.constant 8 : index
    %c0_29 = arith.constant 0 : index
    %84 = vector.load %arg5[%c8_28, %c0_29] : memref<32x128xf32, #tpu.memory_space<vmem>>, vector<8x128xf32>
    %cst_30 = arith.constant dense<0.000000e+00> : vector<16x128xf32>
    %85 = tpu.matmul %83, %84, %cst_30 {dimension_numbers = #tpu.dot_dimension_numbers<[1], [0], [0], [1], [0, 0, 1, 1], [], []>} : vector<16x8xf32>, vector<8x128xf32>, vector<16x128xf32> -> vector<16x128xf32>
    %86 = arith.addf %51, %85 : vector<16x128xf32>
    %87 = vector.extract_strided_slice %11 {offsets = [0, 16], sizes = [16, 8], strides = [1, 1]} : vector<16x32xf32> to vector<16x8xf32>
    %cst_31 = arith.constant -1.000000e+30 : f32
    %88 = vector.broadcast %cst_31 : f32 to vector<16x1xf32>
    %cst_32 = arith.constant 0.000000e+00 : f32
    %89 = vector.broadcast %cst_32 : f32 to vector<16x1xf32>
    %cst_33 = arith.constant 0.000000e+00 : f32
    %90 = vector.broadcast %cst_33 : f32 to vector<16x8xf32>
    %c0_i32_34 = arith.constant 0 : i32
    %91 = arith.subi %arg1, %c0_i32_34 : i32
    %92 = arith.addi %c0_i32_34, %91 : i32
    %c1_i32_35 = arith.constant 1 : i32
    %93:3 = scf.for %arg8 = %c0_i32_34 to %92 step %c1_i32_35 iter_args(%arg9 = %88, %arg10 = %89, %arg11 = %90) -> (vector<16x1xf32>, vector<16x1xf32>, vector<16x8xf32>)  : i32 {
      %c16_i32_58 = arith.constant 16 : i32
      %160 = arith.muli %arg8, %c16_i32_58 : i32
      %161 = tpu.assume_multiple %160, 16 : i32
      %162 = arith.index_cast %161 : i32 to index
      %c16_59 = arith.constant 16 : index
      %163 = vector.load %arg7[%162, %c16_59] : memref<16x64xf32, #tpu.memory_space<vmem>>, vector<16x8xf32>
      %164 = arith.index_cast %161 : i32 to index
      %c48_60 = arith.constant 48 : index
      %165 = vector.load %arg7[%164, %c48_60] : memref<16x64xf32, #tpu.memory_space<vmem>>, vector<16x8xf32>
      %cst_61 = arith.constant dense<0.000000e+00> : vector<16x16xf32>
      %166 = tpu.matmul %87, %163, %cst_61 {dimension_numbers = #tpu.dot_dimension_numbers<[1], [1], [0], [0], [0, 0, 1, 0], [], []>} : vector<16x8xf32>, vector<16x8xf32>, vector<16x16xf32> -> vector<16x16xf32>
      %cst_62 = arith.constant dense<0xFF800000> : vector<16xf32>
      %167 = vector.multi_reduction <maximumf>, %166, %cst_62 [1] : vector<16x16xf32> to vector<16xf32>
      %168 = vector.shape_cast %167 : vector<16xf32> to vector<16x1xf32>
      %169 = arith.maximumf %arg9, %168 : vector<16x1xf32>
      %170 = arith.subf %arg9, %169 : vector<16x1xf32>
      %171 = math.exp %170 : vector<16x1xf32>
      %172 = vector.broadcast %169 : vector<16x1xf32> to vector<16x16xf32>
      %173 = arith.subf %166, %172 : vector<16x16xf32>
      %174 = math.exp %173 : vector<16x16xf32>
      %175 = arith.mulf %171, %arg10 : vector<16x1xf32>
      %cst_63 = arith.constant dense<0.000000e+00> : vector<16xf32>
      %176 = vector.multi_reduction <add>, %174, %cst_63 [1] : vector<16x16xf32> to vector<16xf32>
      %177 = vector.shape_cast %176 : vector<16xf32> to vector<16x1xf32>
      %178 = arith.addf %175, %177 : vector<16x1xf32>
      %cst_64 = arith.constant dense<0.000000e+00> : vector<16x8xf32>
      %179 = tpu.matmul %174, %165, %cst_64 {dimension_numbers = #tpu.dot_dimension_numbers<[1], [0], [0], [1], [0, 0, 1, 1], [], []>} : vector<16x16xf32>, vector<16x8xf32>, vector<16x8xf32> -> vector<16x8xf32>
      %180 = vector.broadcast %171 : vector<16x1xf32> to vector<16x8xf32>
      %181 = arith.mulf %180, %arg11 : vector<16x8xf32>
      %182 = arith.addf %181, %179 : vector<16x8xf32>
      scf.yield %169, %178, %182 : vector<16x1xf32>, vector<16x1xf32>, vector<16x8xf32>
    }
    %94 = arith.index_cast %4 : i32 to index
    %c16 = arith.constant 16 : index
    %95 = vector.load %arg7[%94, %c16] : memref<16x64xf32, #tpu.memory_space<vmem>>, vector<16x8xf32>
    %96 = arith.index_cast %4 : i32 to index
    %c48 = arith.constant 48 : index
    %97 = vector.load %arg7[%96, %c48] : memref<16x64xf32, #tpu.memory_space<vmem>>, vector<16x8xf32>
    %cst_36 = arith.constant dense<0.000000e+00> : vector<16x16xf32>
    %98 = tpu.matmul %87, %95, %cst_36 {dimension_numbers = #tpu.dot_dimension_numbers<[1], [1], [0], [0], [0, 0, 1, 0], [], []>} : vector<16x8xf32>, vector<16x8xf32>, vector<16x16xf32> -> vector<16x16xf32>
    %99 = arith.addf %98, %17 : vector<16x16xf32>
    %cst_37 = arith.constant dense<0xFF800000> : vector<16xf32>
    %100 = vector.multi_reduction <maximumf>, %99, %cst_37 [1] : vector<16x16xf32> to vector<16xf32>
    %101 = vector.shape_cast %100 : vector<16xf32> to vector<16x1xf32>
    %102 = arith.maximumf %93#0, %101 : vector<16x1xf32>
    %103 = arith.subf %93#0, %102 : vector<16x1xf32>
    %104 = math.exp %103 : vector<16x1xf32>
    %105 = vector.broadcast %102 : vector<16x1xf32> to vector<16x16xf32>
    %106 = arith.subf %99, %105 : vector<16x16xf32>
    %107 = math.exp %106 : vector<16x16xf32>
    %108 = arith.mulf %104, %93#1 : vector<16x1xf32>
    %cst_38 = arith.constant dense<0.000000e+00> : vector<16xf32>
    %109 = vector.multi_reduction <add>, %107, %cst_38 [1] : vector<16x16xf32> to vector<16xf32>
    %110 = vector.shape_cast %109 : vector<16xf32> to vector<16x1xf32>
    %111 = arith.addf %108, %110 : vector<16x1xf32>
    %112 = vector.broadcast %104 : vector<16x1xf32> to vector<16x8xf32>
    %113 = arith.mulf %112, %93#2 : vector<16x8xf32>
    %cst_39 = arith.constant dense<0.000000e+00> : vector<16x8xf32>
    %114 = tpu.matmul %107, %97, %cst_39 {dimension_numbers = #tpu.dot_dimension_numbers<[1], [0], [0], [1], [0, 0, 1, 1], [], []>} : vector<16x16xf32>, vector<16x8xf32>, vector<16x8xf32> -> vector<16x8xf32>
    %115 = arith.addf %113, %114 : vector<16x8xf32>
    %116 = tpu.reciprocal %111 {approx = true} : vector<16x1xf32> -> vector<16x1xf32>
    %117 = vector.broadcast %116 : vector<16x1xf32> to vector<16x8xf32>
    %118 = arith.mulf %115, %117 : vector<16x8xf32>
    %c16_40 = arith.constant 16 : index
    %c0_41 = arith.constant 0 : index
    %119 = vector.load %arg5[%c16_40, %c0_41] : memref<32x128xf32, #tpu.memory_space<vmem>>, vector<8x128xf32>
    %cst_42 = arith.constant dense<0.000000e+00> : vector<16x128xf32>
    %120 = tpu.matmul %118, %119, %cst_42 {dimension_numbers = #tpu.dot_dimension_numbers<[1], [0], [0], [1], [0, 0, 1, 1], [], []>} : vector<16x8xf32>, vector<8x128xf32>, vector<16x128xf32> -> vector<16x128xf32>
    %121 = arith.addf %86, %120 : vector<16x128xf32>
    %122 = vector.extract_strided_slice %11 {offsets = [0, 24], sizes = [16, 8], strides = [1, 1]} : vector<16x32xf32> to vector<16x8xf32>
    %cst_43 = arith.constant -1.000000e+30 : f32
    %123 = vector.broadcast %cst_43 : f32 to vector<16x1xf32>
    %cst_44 = arith.constant 0.000000e+00 : f32
    %124 = vector.broadcast %cst_44 : f32 to vector<16x1xf32>
    %cst_45 = arith.constant 0.000000e+00 : f32
    %125 = vector.broadcast %cst_45 : f32 to vector<16x8xf32>
    %c0_i32_46 = arith.constant 0 : i32
    %126 = arith.subi %arg1, %c0_i32_46 : i32
    %127 = arith.addi %c0_i32_46, %126 : i32
    %c1_i32_47 = arith.constant 1 : i32
    %128:3 = scf.for %arg8 = %c0_i32_46 to %127 step %c1_i32_47 iter_args(%arg9 = %123, %arg10 = %124, %arg11 = %125) -> (vector<16x1xf32>, vector<16x1xf32>, vector<16x8xf32>)  : i32 {
      %c16_i32_58 = arith.constant 16 : i32
      %160 = arith.muli %arg8, %c16_i32_58 : i32
      %161 = tpu.assume_multiple %160, 16 : i32
      %162 = arith.index_cast %161 : i32 to index
      %c24_59 = arith.constant 24 : index
      %163 = vector.load %arg7[%162, %c24_59] : memref<16x64xf32, #tpu.memory_space<vmem>>, vector<16x8xf32>
      %164 = arith.index_cast %161 : i32 to index
      %c56_60 = arith.constant 56 : index
      %165 = vector.load %arg7[%164, %c56_60] : memref<16x64xf32, #tpu.memory_space<vmem>>, vector<16x8xf32>
      %cst_61 = arith.constant dense<0.000000e+00> : vector<16x16xf32>
      %166 = tpu.matmul %122, %163, %cst_61 {dimension_numbers = #tpu.dot_dimension_numbers<[1], [1], [0], [0], [0, 0, 1, 0], [], []>} : vector<16x8xf32>, vector<16x8xf32>, vector<16x16xf32> -> vector<16x16xf32>
      %cst_62 = arith.constant dense<0xFF800000> : vector<16xf32>
      %167 = vector.multi_reduction <maximumf>, %166, %cst_62 [1] : vector<16x16xf32> to vector<16xf32>
      %168 = vector.shape_cast %167 : vector<16xf32> to vector<16x1xf32>
      %169 = arith.maximumf %arg9, %168 : vector<16x1xf32>
      %170 = arith.subf %arg9, %169 : vector<16x1xf32>
      %171 = math.exp %170 : vector<16x1xf32>
      %172 = vector.broadcast %169 : vector<16x1xf32> to vector<16x16xf32>
      %173 = arith.subf %166, %172 : vector<16x16xf32>
      %174 = math.exp %173 : vector<16x16xf32>
      %175 = arith.mulf %171, %arg10 : vector<16x1xf32>
      %cst_63 = arith.constant dense<0.000000e+00> : vector<16xf32>
      %176 = vector.multi_reduction <add>, %174, %cst_63 [1] : vector<16x16xf32> to vector<16xf32>
      %177 = vector.shape_cast %176 : vector<16xf32> to vector<16x1xf32>
      %178 = arith.addf %175, %177 : vector<16x1xf32>
      %cst_64 = arith.constant dense<0.000000e+00> : vector<16x8xf32>
      %179 = tpu.matmul %174, %165, %cst_64 {dimension_numbers = #tpu.dot_dimension_numbers<[1], [0], [0], [1], [0, 0, 1, 1], [], []>} : vector<16x16xf32>, vector<16x8xf32>, vector<16x8xf32> -> vector<16x8xf32>
      %180 = vector.broadcast %171 : vector<16x1xf32> to vector<16x8xf32>
      %181 = arith.mulf %180, %arg11 : vector<16x8xf32>
      %182 = arith.addf %181, %179 : vector<16x8xf32>
      scf.yield %169, %178, %182 : vector<16x1xf32>, vector<16x1xf32>, vector<16x8xf32>
    }
    %129 = arith.index_cast %4 : i32 to index
    %c24 = arith.constant 24 : index
    %130 = vector.load %arg7[%129, %c24] : memref<16x64xf32, #tpu.memory_space<vmem>>, vector<16x8xf32>
    %131 = arith.index_cast %4 : i32 to index
    %c56 = arith.constant 56 : index
    %132 = vector.load %arg7[%131, %c56] : memref<16x64xf32, #tpu.memory_space<vmem>>, vector<16x8xf32>
    %cst_48 = arith.constant dense<0.000000e+00> : vector<16x16xf32>
    %133 = tpu.matmul %122, %130, %cst_48 {dimension_numbers = #tpu.dot_dimension_numbers<[1], [1], [0], [0], [0, 0, 1, 0], [], []>} : vector<16x8xf32>, vector<16x8xf32>, vector<16x16xf32> -> vector<16x16xf32>
    %134 = arith.addf %133, %17 : vector<16x16xf32>
    %cst_49 = arith.constant dense<0xFF800000> : vector<16xf32>
    %135 = vector.multi_reduction <maximumf>, %134, %cst_49 [1] : vector<16x16xf32> to vector<16xf32>
    %136 = vector.shape_cast %135 : vector<16xf32> to vector<16x1xf32>
    %137 = arith.maximumf %128#0, %136 : vector<16x1xf32>
    %138 = arith.subf %128#0, %137 : vector<16x1xf32>
    %139 = math.exp %138 : vector<16x1xf32>
    %140 = vector.broadcast %137 : vector<16x1xf32> to vector<16x16xf32>
    %141 = arith.subf %134, %140 : vector<16x16xf32>
    %142 = math.exp %141 : vector<16x16xf32>
    %143 = arith.mulf %139, %128#1 : vector<16x1xf32>
    %cst_50 = arith.constant dense<0.000000e+00> : vector<16xf32>
    %144 = vector.multi_reduction <add>, %142, %cst_50 [1] : vector<16x16xf32> to vector<16xf32>
    %145 = vector.shape_cast %144 : vector<16xf32> to vector<16x1xf32>
    %146 = arith.addf %143, %145 : vector<16x1xf32>
    %147 = vector.broadcast %139 : vector<16x1xf32> to vector<16x8xf32>
    %148 = arith.mulf %147, %128#2 : vector<16x8xf32>
    %cst_51 = arith.constant dense<0.000000e+00> : vector<16x8xf32>
    %149 = tpu.matmul %142, %132, %cst_51 {dimension_numbers = #tpu.dot_dimension_numbers<[1], [0], [0], [1], [0, 0, 1, 1], [], []>} : vector<16x16xf32>, vector<16x8xf32>, vector<16x8xf32> -> vector<16x8xf32>
    %150 = arith.addf %148, %149 : vector<16x8xf32>
    %151 = tpu.reciprocal %146 {approx = true} : vector<16x1xf32> -> vector<16x1xf32>
    %152 = vector.broadcast %151 : vector<16x1xf32> to vector<16x8xf32>
    %153 = arith.mulf %150, %152 : vector<16x8xf32>
    %c24_52 = arith.constant 24 : index
    %c0_53 = arith.constant 0 : index
    %154 = vector.load %arg5[%c24_52, %c0_53] : memref<32x128xf32, #tpu.memory_space<vmem>>, vector<8x128xf32>
    %cst_54 = arith.constant dense<0.000000e+00> : vector<16x128xf32>
    %155 = tpu.matmul %153, %154, %cst_54 {dimension_numbers = #tpu.dot_dimension_numbers<[1], [0], [0], [1], [0, 0, 1, 1], [], []>} : vector<16x8xf32>, vector<8x128xf32>, vector<16x128xf32> -> vector<16x128xf32>
    %156 = arith.addf %121, %155 : vector<16x128xf32>
    %c0_55 = arith.constant 0 : index
    %c0_56 = arith.constant 0 : index
    %c0_57 = arith.constant 0 : index
    %157 = vector.load %arg6[%c0_55, %c0_56, %c0_57] : memref<1x16x128xf32, #tpu.memory_space<vmem>>, vector<1x16x128xf32>
    %158 = vector.shape_cast %157 : vector<1x16x128xf32> to vector<16x128xf32>
    %159 = vector.shape_cast %156 : vector<16x128xf32> to vector<1x16x128xf32>
    tpu.vector_store %arg6[%c0_55, %c0_56, %c0_57], %159 {strides = array<i32>} : memref<1x16x128xf32, #tpu.memory_space<vmem>>, vector<1x16x128xf32>,
    return
  }
  func.func @transform_0(%arg0: i32, %arg1: i32) -> (i32, i32, i32) {
    %c0_i32 = arith.constant 0 : i32
    %c0_i32_0 = arith.constant 0 : i32
    %c0_i32_1 = arith.constant 0 : i32
    return %arg0, %c0_i32, %c0_i32_0 : i32, i32, i32
  }
  func.func @transform_1(%arg0: i32, %arg1: i32) -> (i32, i32) {
    %c0_i32 = arith.constant 0 : i32
    %c0_i32_0 = arith.constant 0 : i32
    %c0_i32_1 = arith.constant 0 : i32
    return %c0_i32, %c0_i32_0 : i32, i32
  }
  func.func @transform_2(%arg0: i32, %arg1: i32) -> (i32, i32) {
    %c0_i32 = arith.constant 0 : i32
    %c0_i32_0 = arith.constant 0 : i32
    %c0_i32_1 = arith.constant 0 : i32
    return %c0_i32, %c0_i32_0 : i32, i32
  }
  func.func @transform_3(%arg0: i32, %arg1: i32) -> (i32, i32) {
    %c0_i32 = arith.constant 0 : i32
    %c0_i32_0 = arith.constant 0 : i32
    %c0_i32_1 = arith.constant 0 : i32
    return %c0_i32, %c0_i32_0 : i32, i32
  }
  func.func @transform_4(%arg0: i32, %arg1: i32) -> (i32, i32, i32) {
    %c0_i32 = arith.constant 0 : i32
    %c0_i32_0 = arith.constant 0 : i32
    return %arg0, %arg1, %c0_i32 : i32, i32, i32
  }
}

</mosaic_0001>

<bundles_post_ra>
// kernel: tpu_custom_call.1
= control target key start
LH: loop header
LB: loop body
LE: loop exit
PB: predicated region body
PF: predicated region fallthrough
CT: control target
= control target key end

     0   :  { %9 = vsyncpa [#allocation4], 0  ;;  %s3805_s0 = inlined_call_operand.hbm [shape: f32[2,16,32], index: 0, kind: input, shape index: {}]   ;;  %s3806_s1 = inlined_call_operand.hbm [shape: f32[32,32], index: 1, kind: input, shape index: {}]   ;;  %s3807_s2 = inlined_call_operand.hbm [shape: f32[32,64], index: 2, kind: input, shape index: {}]   ;;  %s3808_s3 = inlined_call_operand.hbm [shape: f32[32,128], index: 3, kind: input, shape index: {}]   ;;  %s3809_s4 = inlined_call_operand.hbm [shape: f32[2,16,128], index: 4, kind: output, shape index: {}]  }
   0x1   :  { %11 = vsyncpa [#allocation4 + $0x1], 0 }
   0x2   :  { %12 = vsyncpa [#allocation7], 0 }
   0x3   :  { %13 = vsyncpa [#allocation10], 0 }
   0x4   :  { %14 = vsyncpa [#allocation5], 0 }
   0x5   :  { %16 = vsyncpa [#allocation5 + $0x1], 0  ;;  %s3451_s15 = smov 0   ;;  %s3453_s16 = smov 0  }
   0x6   :  { %s3455_s17 = smov 0   ;;  %s3457_s18 = smov 0  }
   0x7   :  { %s3459_s19 = smov 0   ;;  %s3461_s20 = smov 0  }
   0x8 LB: > { %s2819_s21 = sadd.s32 4294967295, %s3407_s20   ;;  %s2820_s22 = sadd.s32 4294967294, %s3407_s20   ;;  %s3407_s20 = sphi %s3461_s20, %s22_s20   ;;  %s3403_s19 = sphi %s3459_s19, %s3830_s19   ;;  %s3399_s18 = sphi %s3457_s18, %s3829_s18   ;;  %s3395_s17 = sphi %s3455_s17, %s3828_s17   ;;  %s3391_s16 = sphi %s3453_s16, %s3827_s16   ;;  %s3387_s15 = sphi %s3451_s15, %s3826_s15  }
   0x9   : > { %p54_p0 = scmp.ne.s32.totalorder %s3391_s16, %s3387_s15  ;;  %p3485_p1 = scmp.eq.s32.totalorder %s2819_s21, 0 }
   0xa   : > { %p3489_p2 = scmp.eq.s32.totalorder %s2819_s21, 1  ;;  %p149_p3 = scmp.eq.s32.totalorder %s2820_s22, 1 }
   0xb   : > { %p3495_p4 = por %p3485_p1, %p54_p0  ;;  %p2821_p5 = scmp.ge.s32.totalorder %s3407_s20, 1 }
   0xc   : > { %p3500_p6 = por %p149_p3, %p54_p0  ;;  %p156_p7 = scmp.lt.s32.totalorder %s3407_s20, 3 }
   0xd   : > { %s3409_s28 = smov [#allocation6]   ;;  %s3410_s5 = smov [#allocation8]  }
   0xe   : > { %s3816_s26 = scalar_select %p3500_p6, 1, 0 }
   0xf   : > { %p3505_p8 = pnand %p2821_p5, %p156_p7  ;;  %s168_s29 = sshll.u32 %s3409_s28, 4  ;;  %s169_s29 = int_to_ptr.vmem [resolvable:$true] %s168_s29 }
  0x10   : > { %s181_s6 = sshll.u32 %s3410_s5, 4  ;;  %s3411_s7 = smov [#allocation9]   ;;  %s182_s6 = int_to_ptr.vmem [resolvable:$true] %s181_s6 }
  0x11   : > { %p3076_p9 = pneg %p3505_p8  ;;  %s194_s8 = sshll.u32 %s3411_s7, 4  ;;  %s195_s8 = int_to_ptr.vmem [resolvable:$true] %s194_s8 }
  0x12   : > { %s3224_s9 = scalar_lea.vmem %s169_s29, 512  ;;  %p3232_p5 = scmp.lt.s32.totalorder %s169_s29, %s169_s29 }
  0x13   : > { %p3514_p11 = pnand %p3076_p9, %p3485_p1  ;;  %p3225_p13 = scmp.ne.s32.totalorder %s169_s29, %s3224_s9 }
  0x14   : > { %p3233_p7 = scmp.lt.s32.totalorder %s3224_s9, %s3224_s9 }
  0x15   : > { %p3215_p12 = pneg %p3514_p11 }
  0x16   : > { %p3234_p9 = por %p3233_p7, %p3232_p5 }
  0x17   : > { %p3227_p0 = pnand %p3225_p13, %p3215_p12 }
  0x19   : > { %p3228_p3 = pneg %p3227_p0 }
  0x1b   : > { %p3235_p10 = pnand %p3234_p9, %p3228_p3 }
  0x1d   : > { %3238 = shalt.err (!%p3235_p10)
}
  0x1e   : > { %s3810_s10 = smov 128   ;;  %s3811_s11 = smov 8  }
  0x1f   : > { %3079 = dma.hbm_to_vmem [thread:$0]  (!%p3514_p11), %s3806_s1, 512, %s169_s29, [#allocation7], %s3810_s10, %s3810_s10, %s3811_s11  }
  0x20   : > { %s3250_s14 = scalar_lea.vmem %s182_s6, 512  ;;  %p3258_p3 = scmp.lt.s32.totalorder %s182_s6, %s182_s6 }
  0x21   : > { %p3251_p13 = scmp.ne.s32.totalorder %s182_s6, %s3250_s14  ;;  %p3259_p10 = scmp.lt.s32.totalorder %s3250_s14, %s3250_s14 }
  0x23   : > { %p3253_p0 = pnand %p3251_p13, %p3215_p12  ;;  %p3260_p7 = por %p3259_p10, %p3258_p3 }
  0x25   : > { %p3254_p5 = pneg %p3253_p0 }
  0x27   : > { %p3261_p9 = pnand %p3260_p7, %p3254_p5 }
  0x29   : > { %3264 = shalt.err (!%p3261_p9)
}
  0x2a   : > { %3082 = dma.hbm_to_vmem [thread:$0]  (!%p3514_p11), %s3807_s2, 512, %s182_s6, [#allocation7], %s3810_s10, %s3810_s10, %s3811_s11  }
  0x2b   : > { %s3276_s28 = scalar_lea.vmem %s195_s8, 512  ;;  %p3284_p3 = scmp.lt.s32.totalorder %s195_s8, %s195_s8 }
  0x2c   : > { %p3277_p6 = scmp.ne.s32.totalorder %s195_s8, %s3276_s28  ;;  %p3285_p5 = scmp.lt.s32.totalorder %s3276_s28, %s3276_s28 }
  0x2e   : > { %p3279_p13 = pnand %p3277_p6, %p3215_p12  ;;  %p3286_p10 = por %p3285_p5, %p3284_p3 }
  0x30   : > { %p3280_p0 = pneg %p3279_p13 }
  0x32   : > { %p3287_p7 = pnand %p3286_p10, %p3280_p0 }
  0x34   : > { %3290 = shalt.err (!%p3287_p7)
}
  0x35   : > { %3085 = dma.hbm_to_vmem [thread:$0]  (!%p3514_p11), %s3808_s3, 512, %s195_s8, [#allocation10], %s3810_s10, %s3810_s10, %s3811_s11  }
  0x36   : > { %s41_s6 = sadd.s32 1, %s3395_s17  ;;  %s34_s30 = sadd.s32 1, %s3403_s19 }
  0x37   : > { %p48_p6 = scmp.ne.s32.totalorder %s3395_s17, %s3391_s16  ;;  %p36_p12 = scmp.ge.s32.totalorder %s34_s30, 2 }
  0x38   : > { %p49_p9 = scmp.eq.s32.totalorder %s3407_s20, 0  ;;  %p3097_p0 = scmp.lt.s32.totalorder %s3407_s20, 2 }
  0x39   : > { %p3560_p13 = por %p3489_p2, %p48_p6  ;;  %s3832_s30 = smov (%p36_p12, %s34_s30), 0 }
  0x3a   : > { %p50_p3 = por %p49_p9, %p48_p6  ;;  %s208_s9 = sand.u32 1, %s3395_s17  }
  0x3b   : > { %s3819_s7 = scalar_select %p3560_p13, 1, 0 }
  0x3c   : > { %s38_s12 = ssub.s32 %s3403_s19, %s3832_s30  ;;  %s2826_s8 = sshll.u32 %s208_s9, 4 }
  0x3d   : > { %p39_p5 = scmp.eq.s32.totalorder %s38_s12, 0  ;;  %s2904_s13 = sshll.u32 %s3403_s19, 8 }
  0x3e   : > { %s218_s24 = scalar_lea.hbm %s3805_s0, %s2904_s13  ;;  %s212_s28 = scalar_lea.vmem [#allocation3], %s2826_s8 }
  0x3f   : > { %s3572_s14 = scalar_select %p39_p5, %s3395_s17, %s41_s6  }
  0x40   : > { %s219_s29 = sshll.u32 %s212_s28, 4  ;;  %p3579_p2 = pnand %p3097_p0, %p50_p3  ;;  %s220_s29 = int_to_ptr.vmem [resolvable:$true] %s219_s29 }
  0x41   : > { %s209_s10 = scalar_lea.sflag [#allocation4], %s208_s9  ;;  %s3304_s12 = scalar_lea.vmem %s220_s29, 256 }
  0x42   : > { %p3293_p11 = pneg %p3579_p2  ;;  %p3305_p10 = scmp.ne.s32.totalorder %s220_s29, %s3304_s12 }
  0x43   : > { %s3414_s6 = smov [#allocation3]  }
  0x44   : > { %p3307_p7 = pnand %p3305_p10, %p3293_p11  ;;  %s3309_s11 = sshll.u32 %s3414_s6, 4  ;;  %s3310_s11 = int_to_ptr.vmem [resolvable:$false] %s3309_s11 }
  0x45   : > { %s3311_s13 = scalar_lea.vmem %s3310_s11, 512  ;;  %p3312_p12 = scmp.lt.s32.totalorder %s220_s29, %s3310_s11 }
  0x46   : > { %p3308_p6 = pneg %p3307_p7  ;;  %p3313_p9 = scmp.lt.s32.totalorder %s3311_s13, %s3304_s12 }
  0x48   : > { %p3314_p5 = por %p3313_p9, %p3312_p12 }
  0x4a   : > { %p3315_p13 = pnand %p3314_p5, %p3308_p6 }
  0x4c   : > { %3318 = shalt.err (!%p3315_p13)
}
  0x4d   : > { %s3821_s8 = smov 8   ;;  %s3822_s21 = smov 128  }
  0x4e   : > { %3089 = dma.hbm_to_vmem [thread:$0]  (!%p3579_p2), %s218_s24, 256, %s220_s29, %s209_s10, %s3822_s21, %s3822_s21, %s3821_s8  }
  0x4f   : > { %231 = sbr.rel (%p3505_p8) target bundleno = 2212 (0x8a4), region = 36  ;;  %s3593_s9 = sand.u32 (!%p3505_p8), 1, %s3391_s16  }
  0x50   : > { %s2830_s11 = sshll.u32 (!%p3505_p8), %s3593_s9, 4  ;;  %s234_s22 = scalar_lea.sflag (!%p3505_p8), [#allocation4], %s3593_s9 }
  0x51   : > { %s237_s28 = scalar_lea.vmem (!%p3505_p8), [#allocation3], %s2830_s11 }
  0x54   : > { %3370 = dma.done.wait (%p3495_p4), %s234_s22, 256  }
  0x55   : > { %3372 = vsyncadd (%p3495_p4), %s234_s22, 4294967040 }
  0x56   : > { %3374 = dma.done.wait (%p3485_p1), [#allocation7], 1024  }
  0x57   : > { %3376 = vsyncadd (%p3485_p1), [#allocation7], 4294966272 }
  0x58   : > { %3378 = dma.done.wait (%p3485_p1), [#allocation10], 512  }
  0x59   : > { %3380 = vsyncadd (%p3485_p1), [#allocation10], 4294966784  ;;  %vm285_vm0 = vcmask 261120   ;;  %v284_v0 = vld [vmem:[#allocation8 + $0x18] sm:$0xff]  ;;  %v283_v1 = vld [vmem:[#allocation8 + $0x10] sm:$0xff]  ;;  %vm367_vm1 = vcmask 523264   ;;  %v462_v20 = vlaneseq }
  0x5a   : > { %2962 = vmatprep.subr.mxu0 %v284_v0  ;;  %v279_v2 = vld [vmem:[%s237_s28] sm:$0xff]  ;;  %v282_v3 = vld [vmem:[#allocation8 + $0x8] sm:$0xff]  ;;  %v377_v4 = vld [vmem:[#allocation6 + $0x18] sm:$0xff]  ;;  %vm700_vm2 = vcmask 64512   ;;  %s3415_s23 = smov 96   ;;  %s3416_s25 = smov 120  }
  0x5b   : > { %2963 = vmatpush3.msra.mxu0 %v284_v0  ;;  %2970 = vmatprep.mubr.msk.f32.mxu0 %vm285_vm0, %v279_v2  ;;  %v376_v5 = vld [vmem:[#allocation6 + $0x10] sm:$0xff]  ;;  %v281_v6 = vld [vmem:[#allocation8] sm:$0xff]  ;;  %v375_v7 = vld [vmem:[#allocation6 + $0x8] sm:$0xff]  ;;  %v463_v21 = vshrl.u32 %v462_v20, 7  ;;  %v466_v23 = vand.u32 127, %v462_v20  ;;  %v3417_v25 = vmov 0.0  }
  0x5c   : > { %2964 = vmatprep.subr.mxu0 %v283_v1  ;;  %2973 = vmatprep.subr.mxu1 %v377_v4  ;;  %v280_v8 = vld [vmem:[%s237_s28 + $0x8] sm:$0xff]  ;;  %v374_v9 = vld [vmem:[#allocation6] sm:$0xff]  ;;  %vm788_vm5 = vcmask 130048   ;;  %s3418_s27 = smov 88   ;;  %s3419_s10 = smov 112  }
  0x5d   : > { %2965 = vmatpush3.msra.mxu0 %v283_v1  ;;  %2974 = vmatpush3.msra.mxu1 %v377_v4  ;;  %v464_v22 = vadd.s32 8, %v463_v21  ;;  %vm467_vm3 = vcmp.gt.s32.totalorder %v466_v23, %v463_v21  ;;  %s3420_s24 = smov 104   ;;  %s3421_s29 = smov 80  }
  0x5e   : > { %2966 = vmatprep.subr.mxu0 %v282_v3  ;;  %2975 = vmatprep.subr.mxu1 %v376_v5  ;;  %v3640_v26 = vsel %vm467_vm3, -1e+30, %v3417_v25  ;;  %s3422_s5 = smov 72   ;;  %s273_s12 = scalar_lea.vmem [#allocation11], %s2830_s11 }
  0x5f   : > { %2967 = vmatpush3.msra.mxu0 %v282_v3  ;;  %2976 = vmatpush3.msra.mxu1 %v376_v5  ;;  %vm468_vm4 = vcmp.gt.s32.totalorder %v466_v23, %v464_v22  ;;  %v914_v23 = vld [vmem:[#allocation9] sm:$0xff]  ;;  %s2602_s6 = sshll.u32 %s273_s12, 4  ;;  %s2905_s13 = sshll.u32 %s3399_s18, 8  ;;  %s3752_s6 = int_to_ptr.vmem [resolvable:$true] %s2602_s6 }
  0x60   : > { %2968 = vmatprep.subr.mxu0 %v281_v6  ;;  %2977 = vmatprep.subr.mxu1 %v375_v7  ;;  %v3642_v27 = vsel %vm468_vm4, -1e+30, %v3417_v25  ;;  %s3757_s22 = scalar_lea.hbm %s3809_s4, %s2905_s13  ;;  %s2587_s28 = scalar_lea.sflag [#allocation5], %s3593_s9 }
  0x61   : > { %2969 = vmatpush3.msra.mxu0 %v281_v6  ;;  %2978 = vmatpush3.msra.mxu1 %v375_v7  ;;  %s3319_s11 = scalar_lea.vmem %s3752_s6, 256  ;;  %p3823_p4 = scmp.ne.s32.totalorder %s3819_s7, 0 }
  0x62   : > { %2971 = vmatmul.mubr.msk.f32.vlgmr.msra.gmra.mxu0 %vm285_vm0, %v280_v8  ;;  %2979 = vmatprep.subr.mxu1 %v374_v9  ;;  %p3320_p1 = scmp.ne.s32.totalorder %s3752_s6, %s3319_s11  ;;  %s3423_s18 = smov [#allocation11]  }
  0x63   : > { %2980 = vmatpush3.msra.mxu1 %v374_v9  ;;  %2981 = vmatprep.mubr.msk.f32.mxu1 %vm285_vm0, %v279_v2 }
  0x64   : > { %2982 = vmatmul.mubr.msk.f32.vlgmr.msra.gmra.mxu1 %vm285_vm0, %v280_v8  ;;  %p3321_p8 = pnand %p3320_p1, %p3823_p4 }
  0x66   : > { %p3322_p13 = pneg %p3321_p8 }
 0x122   : > { %v2972_v10 = vpop.f32.mrf.mxu0 }
 0x123   : > { %369 = vst.msk [vmem:[#allocation2 + $0x8] sm:$0xff] %vm367_vm1, %v2972_v10 }
 0x124   : > { %v358_v11 = vpop.f32.mrf.mxu0  ;;  %v2983_v12 = vpop.f32.mrf.mxu1 }
 0x125   : > { %368 = vst.msk [vmem:[#allocation2] sm:$0xff] %vm367_vm1, %v358_v11  ;;  %v3633_v17 = vmul.f32 0.35355338, %v2983_v12  ;;  %v1361_v11 = vld [vmem:[#allocation9 + $0x8] sm:$0xff] }
 0x126   : > { %v451_v13 = vpop.f32.mrf.mxu1 }
 0x127   : > { %v3615_v14 = vmul.f32 0.35355338, %v451_v13 }
 0x129   : > { %2988 = vmatprep.mubr.msk.f32.mxu0 %vm700_vm2, %v3615_v14 }
 0x12a   : > { %v3619_v15 = vld [vmem:[#allocation2 + $0x8] sm:$0xff] }
 0x12b   : > { %823 = vrot.lane.b32.xlu1 %v3619_v15, %s3415_s23  ;;  %2984 = vmatprep.subr.msk.mxu0 %vm700_vm2, %v3619_v15 }
 0x12c   : > { %2985 = vmatpush3.xpose.msk.msra.mxu0 %vm700_vm2, %v3619_v15  ;;  %v3626_v16 = vld [vmem:[#allocation2] sm:$0xff] }
 0x12d   : > { %2986 = vmatprep.subr.msk.mxu0 %vm700_vm2, %v3626_v16 }
 0x12f   : > { %821 = vrot.lane.b32.xlu1 %v3626_v16, %s3415_s23  ;;  %s3323_s23 = sshll.u32 %s3423_s18, 4  ;;  %s3324_s23 = int_to_ptr.vmem [resolvable:$false] %s3323_s23 }
 0x130   : > { %2987 = vmatpush3.xpose.msk.msra.mxu0 %vm700_vm2, %v3626_v16  ;;  %p3326_p0 = scmp.lt.s32.totalorder %s3752_s6, %s3324_s23 }
 0x133   : > { %1149 = vrot.lane.b32.xlu1 %v3626_v16, %s3416_s25  ;;  %2989 = vmatmul.mubr.msk.f32.vlgmr.msra.gmra.mxu0 %vm700_vm2, %v3633_v17 }
 0x137   : > { %1145 = vrot.lane.b32.xlu1 %v3615_v14, %s3416_s25 }
 0x13b   : > { %1147 = vrot.lane.b32.xlu1 %v3633_v17, %s3416_s25 }
 0x19d   : > { %v824_v18 = vpop.permute.xlu1 %823 }
 0x19e   : > { %2991 = vmatprep.subr.mxu1 %v824_v18 }
 0x19f   : > { %2992 = vmatpush3.msra.mxu1 %v824_v18 }
 0x1a1   : > { %v822_v19 = vpop.permute.xlu1 %821 }
 0x1a2   : > { %2993 = vmatprep.subr.mxu1 %v822_v19 }
 0x1a3   : > { %2994 = vmatpush3.msra.mxu1 %v822_v19 }
 0x1a5   : > { %v1150_v42 = vpop.permute.xlu1 %1149 }
 0x1a9   : > { %v1146_v45 = vpop.permute.xlu1 %1145 }
 0x1ad   : > { %v1148_v46 = vpop.permute.xlu1 %1147 }
 0x1f3   : > { %v2990_v24 = vpop.f32.mrf.mxu0 }
 0x1f4   : > { %v785_v30 = vadd.f32 %v2990_v24, %v3642_v27 }
 0x1f5   : > { %v779_v28 = vpop.f32.mrf.mxu0 }
 0x1f6   : > { %v780_v29 = vadd.f32 %v779_v28, %v3640_v26  ;;  %v792_v32 = vsel %vm788_vm5, %v785_v30, -inf }
 0x1f8   : > { %v789_v31 = vsel %vm788_vm5, %v780_v29, -inf }
 0x1f9   : > { %790 = vmax.xlane.f32.xlu0 %v789_v31 }
 0x1fd   : > { %793 = vmax.xlane.f32.xlu0 %v792_v32 }
 0x213   : > { %1151 = vrot.lane.b32.xlu0 %v3619_v15, %s3416_s25  ;;  %s3325_s25 = scalar_lea.vmem %s3324_s23, 512 }
 0x214   : > { %p3327_p3 = scmp.lt.s32.totalorder %s3325_s25, %s3319_s11 }
 0x216   : > { %p3328_p2 = por %p3327_p3, %p3326_p0 }
 0x218   : > { %p3329_p11 = pnand %p3328_p2, %p3322_p13 }
 0x282   : > { %v791_v33 = vpop.xlane.xlu0 %790 }
 0x283   : > { %v795_v34 = vmax.f32 %v791_v33, -1e+30 }
 0x285   : > { %v803_v35 = vsub.f32 %v780_v29, %v795_v34  ;;  %v797_v48 = vsub.f32 -1e+30, %v795_v34 }
 0x286   : > { %v794_v36 = vpop.xlane.xlu0 %793 }
 0x287   : > { %v805_v37 = vmul.f32 1.442695, %v803_v35  ;;  %v796_v38 = vmax.f32 %v794_v36, -1e+30  ;;  %v799_v50 = vmul.f32 1.442695, %v797_v48 }
 0x289   : > { %v804_v39 = vsub.f32 %v785_v30, %v796_v38  ;;  %3165 = vpow2.f32 %v805_v37  ;;  %v798_v47 = vsub.f32 -1e+30, %v796_v38 }
 0x28a   : > { %v1152_v40 = vpop.permute.xlu0 %1151 }
 0x28b   : > { %v807_v41 = vmul.f32 1.442695, %v804_v39  ;;  %2998 = vmatprep.subr.msk.mxu1 %vm700_vm2, %v1152_v40  ;;  %v801_v49 = vmul.f32 1.442695, %v798_v47 }
 0x28d   : > { %3167 = vpow2.f32 %v807_v41 }
 0x28e   : > { %3169 = vpow2.f32 %v801_v49 }
 0x28f   : > { %3171 = vpow2.f32 %v799_v50 }
 0x296   : > { %v3650_v43 = vpop.eup %3165 }
 0x297   : > { %2995 = vmatprep.mubr.msk.f32.mxu1 %vm788_vm5, %v3650_v43  ;;  %v811_v22 = vsel %vm788_vm5, %v3650_v43, 0.0 }
 0x29a   : > { %v3654_v44 = vpop.eup %3167 }
 0x29b   : > { %2996 = vmatmul.mubr.msk.f32.vlgmr.msra.gmra.mxu1 %vm788_vm5, %v3654_v44  ;;  %v3170_v51 = vpop.eup %3169  ;;  %v814_v21 = vsel %vm788_vm5, %v3654_v44, 0.0 }
 0x29c   : > { %2999 = vmatpush3.xpose.msk.msra.mxu1 %vm700_vm2, %v1152_v40  ;;  %3002 = vmatprep.mubr.msk.f32.mxu1 %vm700_vm2, %v1146_v45  ;;  %v3172_v52 = vpop.eup %3171  ;;  %v3663_v53 = vmul.f32 0.0, %v3170_v51 }
 0x29d   : > { %3000 = vmatprep.subr.msk.mxu1 %vm700_vm2, %v1150_v42  ;;  %v3668_v56 = vmul.f32 0.0, %v3172_v52 }
 0x2a0   : > { %3001 = vmatpush3.xpose.msk.msra.mxu1 %vm700_vm2, %v1150_v42 }
 0x2a1   : > { %3017 = vmatprep.subr.mxu1 %v914_v23 }
 0x2a3   : > { %3003 = vmatmul.mubr.msk.f32.vlgmr.msra.gmra.mxu1 %vm700_vm2, %v1148_v46 }
 0x2a4   : > { %3018 = vmatpush3.msra.mxu1 %v914_v23 }
 0x35b   : > { %v2997_v54 = vpop.f32.mrf.mxu1 }
 0x35c   : > { %v3666_v55 = vadd.f32 %v2997_v54, %v3663_v53 }
 0x35d   : > { %v899_v57 = vpop.f32.mrf.mxu1 }
 0x35e   : > { %v3671_v58 = vadd.f32 %v899_v57, %v3668_v56 }
 0x363   : > { %v3004_v59 = vpop.f32.mrf.mxu1 }
 0x364   : > { %v1233_v60 = vadd.f32 %v3004_v59, %v3642_v27 }
 0x365   : > { %v1227_v61 = vpop.f32.mrf.mxu1 }
 0x366   : > { %v1228_v62 = vadd.f32 %v1227_v61, %v3640_v26  ;;  %v1239_v63 = vsel %vm788_vm5, %v1233_v60, -inf }
 0x367   : > { %1240 = vmax.xlane.f32.xlu0 %v1239_v63 }
 0x368   : > { %v1236_v0 = vsel %vm788_vm5, %v1228_v62, -inf }
 0x369   : > { %1237 = vmax.xlane.f32.xlu1 %v1236_v0 }
 0x37a   : > { %1270 = vrot.lane.b32.xlu1 %v3619_v15, %s3418_s27 }
 0x37d   : > { %1268 = vrot.lane.b32.xlu0 %v3626_v16, %s3418_s27 }
 0x37e   : > { %1760 = vrot.lane.b32.xlu1 %v3619_v15, %s3419_s10 }
 0x3f0   : > { %v1241_v1 = vpop.xlane.xlu0 %1240 }
 0x3f1   : > { %v1243_v2 = vmax.f32 %v1241_v1, -1e+30 }
 0x3f2   : > { %v1238_v3 = vpop.xlane.xlu1 %1237 }
 0x3f3   : > { %v1251_v4 = vsub.f32 %v1233_v60, %v1243_v2  ;;  %v1242_v5 = vmax.f32 %v1238_v3, -1e+30  ;;  %v1245_v25 = vsub.f32 -1e+30, %v1243_v2 }
 0x3f4   : > { %v1269_v10 = vpop.permute.xlu0 %1268 }
 0x3f5   : > { %v1254_v6 = vmul.f32 1.442695, %v1251_v4  ;;  %v1250_v7 = vsub.f32 %v1228_v62, %v1242_v5  ;;  %v1244_v24 = vsub.f32 -1e+30, %v1242_v5  ;;  %v1248_v29 = vmul.f32 1.442695, %v1245_v25 }
 0x3f6   : > { %v1271_v8 = vpop.permute.xlu1 %1270 }
 0x3f7   : > { %v1252_v9 = vmul.f32 1.442695, %v1250_v7  ;;  %3005 = vmatprep.subr.mxu0 %v1271_v8  ;;  %3173 = vpow2.f32 %v1254_v6  ;;  %v1246_v28 = vmul.f32 1.442695, %v1244_v24 }
 0x3f8   : > { %3006 = vmatpush3.msra.mxu0 %v1271_v8 }
 0x3f9   : > { %3007 = vmatprep.subr.mxu0 %v1269_v10  ;;  %3175 = vpow2.f32 %v1252_v9 }
 0x3fa   : > { %3008 = vmatpush3.msra.mxu0 %v1269_v10  ;;  %v1761_v20 = vpop.permute.xlu1 %1760  ;;  %3177 = vpow2.f32 %v1246_v28 }
 0x3fb   : > { %3012 = vmatprep.subr.mxu0 %v1361_v11  ;;  %3179 = vpow2.f32 %v1248_v29  ;;  %v1970_v29 = vld [vmem:[#allocation9 + $0x10] sm:$0xff] }
 0x404   : > { %v3174_v12 = vpop.eup %3173 }
 0x405   : > { %v1261_v13 = vsel %vm788_vm5, %v3174_v12, 0.0 }
 0x406   : > { %v3176_v18 = vpop.eup %3175  ;;  %1262 = vadd.xlane.f32.xlu0 %v1261_v13 }
 0x407   : > { %3009 = vmatprep.mubr.msk.f32.mxu0 %vm788_vm5, %v3176_v18  ;;  %v1258_v19 = vsel %vm788_vm5, %v3176_v18, 0.0  ;;  %v3178_v30 = vpop.eup %3177 }
 0x408   : > { %1259 = vadd.xlane.f32.xlu1 %v1258_v19  ;;  %3010 = vmatmul.mubr.msk.f32.vlgmr.msra.gmra.mxu0 %vm788_vm5, %v3174_v12  ;;  %v3180_v31 = vpop.eup %3179  ;;  %v1256_v32 = vmul.f32 0.0, %v3178_v30 }
 0x409   : > { %3013 = vmatpush3.msra.mxu0 %v1361_v11  ;;  %v1257_v33 = vmul.f32 0.0, %v3180_v31 }
 0x40a   : > { %3022 = vmatprep.subr.msk.mxu0 %vm700_vm2, %v1761_v20 }
 0x419   : > { %1754 = vrot.lane.b32.xlu1 %v3615_v14, %s3419_s10 }
 0x41c   : > { %1758 = vrot.lane.b32.xlu0 %v3626_v16, %s3419_s10 }
 0x41d   : > { %1756 = vrot.lane.b32.xlu1 %v3633_v17, %s3419_s10 }
 0x420   : > { %2288 = vrot.lane.b32.xlu0 %v3626_v16, %s3420_s24 }
 0x421   : > { %2290 = vrot.lane.b32.xlu1 %v3619_v15, %s3420_s24 }
 0x424   : > { %2286 = vrot.lane.b32.xlu0 %v3633_v17, %s3420_s24 }
 0x425   : > { %2284 = vrot.lane.b32.xlu1 %v3615_v14, %s3420_s24 }
 0x443   : > { %815 = vadd.xlane.f32.xlu0 %v814_v21 }
 0x449   : > { %812 = vadd.xlane.f32.xlu1 %v811_v22 }
 0x48f   : > { %v1263_v17 = vpop.xlane.xlu0 %1262 }
 0x490   : > { %v1265_v36 = vadd.f32 %v1263_v17, %v1257_v33 }
 0x491   : > { %v1260_v14 = vpop.xlane.xlu1 %1259 }
 0x492   : > { %v1264_v34 = vadd.f32 %v1260_v14, %v1256_v32 }
 0x493   : > { %v1759_v35 = vpop.permute.xlu0 %1758 }
 0x494   : > { %3181 = vrcp.f32 %v1264_v34 }
 0x495   : > { %v1755_v37 = vpop.permute.xlu1 %1754  ;;  %3183 = vrcp.f32 %v1265_v36 }
 0x497   : > { %v2289_v38 = vpop.permute.xlu0 %2288 }
 0x499   : > { %v1757_v39 = vpop.permute.xlu1 %1756 }
 0x49b   : > { %v2287_v40 = vpop.permute.xlu0 %2286 }
 0x49d   : > { %v2291_v41 = vpop.permute.xlu1 %2290 }
 0x4a1   : > { %v3182_v46 = vpop.eup %3181  ;;  %v2285_v51 = vpop.permute.xlu1 %2284 }
 0x4a2   : > { %v3184_v48 = vpop.eup %3183 }
 0x4c8   : > { %v3011_v42 = vpop.f32.mrf.mxu0 }
 0x4c9   : > { %v1356_v43 = vadd.f32 %v3011_v42, %v1257_v33 }
 0x4ca   : > { %v1346_v44 = vpop.f32.mrf.mxu0 }
 0x4cb   : > { %v1355_v45 = vadd.f32 %v1346_v44, %v1256_v32  ;;  %v1360_v52 = vmul.f32 %v3184_v48, %v1356_v43 }
 0x4cc   : > { %v816_v47 = vpop.xlane.xlu0 %815 }
 0x4cd   : > { %v1359_v49 = vmul.f32 %v3182_v46, %v1355_v45  ;;  %v818_v50 = vadd.f32 %v816_v47, %v3663_v53 }
 0x4cf   : > { %3185 = vrcp.f32 %v818_v50  ;;  %3014 = vmatprep.mubr.msk.f32.mxu0 %vm700_vm2, %v1359_v49 }
 0x4d0   : > { %3015 = vmatmul.mubr.msk.f32.vlgmr.msra.gmra.mxu0 %vm700_vm2, %v1360_v52 }
 0x4d1   : > { %3023 = vmatpush3.xpose.msk.msra.mxu0 %vm700_vm2, %v1761_v20  ;;  %3026 = vmatprep.mubr.msk.f32.mxu0 %vm700_vm2, %v1755_v37 }
 0x4d2   : > { %3024 = vmatprep.subr.msk.mxu0 %vm700_vm2, %v1759_v35  ;;  %v813_v54 = vpop.xlane.xlu1 %812 }
 0x4d3   : > { %v817_v57 = vadd.f32 %v813_v54, %v3668_v56 }
 0x4d5   : > { %3187 = vrcp.f32 %v817_v57  ;;  %3025 = vmatpush3.xpose.msk.msra.mxu0 %vm700_vm2, %v1759_v35 }
 0x4d6   : > { %3041 = vmatprep.subr.msk.mxu0 %vm700_vm2, %v2291_v41 }
 0x4d8   : > { %3027 = vmatmul.mubr.msk.f32.vlgmr.msra.gmra.mxu0 %vm700_vm2, %v1757_v39 }
 0x4d9   : > { %3042 = vmatpush3.xpose.msk.msra.mxu0 %vm700_vm2, %v2291_v41  ;;  %3045 = vmatprep.mubr.msk.f32.mxu0 %vm700_vm2, %v2285_v51 }
 0x4da   : > { %3043 = vmatprep.subr.msk.mxu0 %vm700_vm2, %v2289_v38 }
 0x4dc   : > { %v3186_v53 = vpop.eup %3185 }
 0x4dd   : > { %3044 = vmatpush3.xpose.msk.msra.mxu0 %vm700_vm2, %v2289_v38  ;;  %v913_v59 = vmul.f32 %v3186_v53, %v3666_v55 }
 0x4e0   : > { %3046 = vmatmul.mubr.msk.f32.vlgmr.msra.gmra.mxu0 %vm700_vm2, %v2287_v40 }
 0x4e2   : > { %v3188_v56 = vpop.eup %3187 }
 0x4e3   : > { %v912_v60 = vmul.f32 %v3188_v56, %v3671_v58 }
 0x4e5   : > { %3019 = vmatprep.mubr.msk.f32.mxu1 %vm700_vm2, %v912_v60 }
 0x4e6   : > { %3020 = vmatmul.mubr.msk.f32.vlgmr.msra.gmra.mxu1 %vm700_vm2, %v913_v59 }
 0x590   : > { %v3016_v61 = vpop.f32.mrf.mxu0 }
 0x592   : > { %v3719_v62 = vpop.f32.mrf.mxu0 }
 0x598   : > { %v3028_v63 = vpop.f32.mrf.mxu0 }
 0x599   : > { %v1842_v0 = vadd.f32 %v3028_v63, %v3642_v27 }
 0x59a   : > { %v1836_v1 = vpop.f32.mrf.mxu0 }
 0x59b   : > { %v1837_v2 = vadd.f32 %v1836_v1, %v3640_v26  ;;  %v1848_v55 = vsel %vm788_vm5, %v1842_v0, -inf }
 0x59c   : > { %1849 = vmax.xlane.f32.xlu1 %v1848_v55 }
 0x59d   : > { %v1845_v3 = vsel %vm788_vm5, %v1837_v2, -inf }
 0x59e   : > { %1846 = vmax.xlane.f32.xlu0 %v1845_v3 }
 0x5a0   : > { %v3047_v5 = vpop.f32.mrf.mxu0 }
 0x5a1   : > { %v2372_v7 = vadd.f32 %v3047_v5, %v3642_v27 }
 0x5a2   : > { %v2366_v6 = vpop.f32.mrf.mxu0 }
 0x5a3   : > { %v2367_v8 = vadd.f32 %v2366_v6, %v3640_v26  ;;  %v2378_v9 = vsel %vm788_vm5, %v2372_v7, -inf }
 0x5a5   : > { %v2375_v10 = vsel %vm788_vm5, %v2367_v8, -inf }
 0x5a6   : > { %v3021_v58 = vpop.f32.mrf.mxu1 }
 0x5a7   : > { %v3725_v4 = vadd.f32 %v3021_v58, %v3016_v61 }
 0x5a8   : > { %v1515_v51 = vpop.f32.mrf.mxu1 }
 0x5ad   : > { %1877 = vrot.lane.b32.xlu1 %v3626_v16, %s3421_s29 }
 0x5b4   : > { %1879 = vrot.lane.b32.xlu0 %v3619_v15, %s3421_s29 }
 0x5d1   : > { %2379 = vmax.xlane.f32.xlu1 %v2378_v9 }
 0x5d3   : > { %2376 = vmax.xlane.f32.xlu0 %v2375_v10 }
 0x625   : > { %v1850_v11 = vpop.xlane.xlu1 %1849 }
 0x626   : > { %v1852_v12 = vmax.f32 %v1850_v11, -1e+30 }
 0x627   : > { %v1847_v13 = vpop.xlane.xlu0 %1846 }
 0x628   : > { %v1860_v18 = vsub.f32 %v1842_v0, %v1852_v12  ;;  %v1851_v19 = vmax.f32 %v1847_v13, -1e+30  ;;  %v1854_v41 = vsub.f32 -1e+30, %v1852_v12  ;;  %v2500_v0 = vld [vmem:[#allocation9 + $0x18] sm:$0xff]  ;;  %v1516_v13 = vadd.f32 %v1515_v51, %v3719_v62 }
 0x629   : > { %v1878_v27 = vpop.permute.xlu1 %1877 }
 0x62a   : > { %v1863_v20 = vmul.f32 1.442695, %v1860_v18  ;;  %v1859_v21 = vsub.f32 %v1837_v2, %v1851_v19  ;;  %v1853_v40 = vsub.f32 -1e+30, %v1851_v19  ;;  %v1857_v43 = vmul.f32 1.442695, %v1854_v41 }
 0x62b   : > { %v1880_v22 = vpop.permute.xlu0 %1879 }
 0x62c   : > { %v1861_v23 = vmul.f32 1.442695, %v1859_v21  ;;  %3029 = vmatprep.subr.mxu1 %v1880_v22  ;;  %3189 = vpow2.f32 %v1863_v20  ;;  %v1855_v42 = vmul.f32 1.442695, %v1853_v40 }
 0x62d   : > { %3030 = vmatpush3.msra.mxu1 %v1880_v22 }
 0x62e   : > { %3031 = vmatprep.subr.mxu1 %v1878_v27  ;;  %3191 = vpow2.f32 %v1861_v23 }
 0x62f   : > { %3032 = vmatpush3.msra.mxu1 %v1878_v27 }
 0x630   : > { %3036 = vmatprep.subr.mxu1 %v1970_v29 }
 0x639   : > { %v3190_v26 = vpop.eup %3189 }
 0x63a   : > { %v1870_v24 = vsel %vm788_vm5, %v3190_v26, 0.0 }
 0x63b   : > { %v3192_v25 = vpop.eup %3191  ;;  %1871 = vadd.xlane.f32.xlu0 %v1870_v24 }
 0x63c   : > { %3033 = vmatprep.mubr.msk.f32.mxu1 %vm788_vm5, %v3192_v25  ;;  %v1867_v28 = vsel %vm788_vm5, %v3192_v25, 0.0 }
 0x63d   : > { %1868 = vadd.xlane.f32.xlu1 %v1867_v28  ;;  %3034 = vmatmul.mubr.msk.f32.vlgmr.msra.gmra.mxu1 %vm788_vm5, %v3190_v26 }
 0x63e   : > { %3037 = vmatpush3.msra.mxu1 %v1970_v29 }
 0x64e   : > { %2407 = vrot.lane.b32.xlu1 %v3626_v16, %s3422_s5 }
 0x651   : > { %2409 = vrot.lane.b32.xlu0 %v3619_v15, %s3422_s5 }
 0x65a   : > { %v2380_v17 = vpop.xlane.xlu1 %2379 }
 0x65b   : > { %v2382_v30 = vmax.f32 %v2380_v17, -1e+30 }
 0x65c   : > { %v2377_v14 = vpop.xlane.xlu0 %2376 }
 0x65d   : > { %v2390_v31 = vsub.f32 %v2372_v7, %v2382_v30  ;;  %v2381_v32 = vmax.f32 %v2377_v14, -1e+30  ;;  %v2384_v2 = vsub.f32 -1e+30, %v2382_v30 }
 0x65f   : > { %v2393_v33 = vmul.f32 1.442695, %v2390_v31  ;;  %v2389_v34 = vsub.f32 %v2367_v8, %v2381_v32  ;;  %v2383_v1 = vsub.f32 -1e+30, %v2381_v32  ;;  %v2387_v3 = vmul.f32 1.442695, %v2384_v2 }
 0x661   : > { %v2391_v35 = vmul.f32 1.442695, %v2389_v34  ;;  %3193 = vpow2.f32 %v2393_v33  ;;  %v2385_v55 = vmul.f32 1.442695, %v2383_v1 }
 0x663   : > { %3195 = vpow2.f32 %v2391_v35 }
 0x664   : > { %3197 = vpow2.f32 %v1855_v42 }
 0x665   : > { %3199 = vpow2.f32 %v1857_v43 }
 0x66e   : > { %v3194_v36 = vpop.eup %3193 }
 0x66f   : > { %v2400_v37 = vsel %vm788_vm5, %v3194_v36, 0.0 }
 0x670   : > { %v3196_v38 = vpop.eup %3195  ;;  %2401 = vadd.xlane.f32.xlu0 %v2400_v37 }
 0x671   : > { %v2397_v39 = vsel %vm788_vm5, %v3196_v38, 0.0  ;;  %v3198_v44 = vpop.eup %3197 }
 0x672   : > { %2398 = vadd.xlane.f32.xlu1 %v2397_v39  ;;  %v3200_v45 = vpop.eup %3199  ;;  %v1865_v47 = vmul.f32 0.0, %v3198_v44 }
 0x673   : > { %v1866_v48 = vmul.f32 0.0, %v3200_v45 }
 0x6c4   : > { %v1872_v16 = vpop.xlane.xlu0 %1871 }
 0x6c5   : > { %v1874_v50 = vadd.f32 %v1872_v16, %v1866_v48 }
 0x6c6   : > { %v1869_v46 = vpop.xlane.xlu1 %1868 }
 0x6c7   : > { %v1873_v49 = vadd.f32 %v1869_v46, %v1865_v47 }
 0x6c8   : > { %v2410_v15 = vpop.permute.xlu0 %2409 }
 0x6c9   : > { %3048 = vmatprep.subr.mxu1 %v2410_v15  ;;  %3201 = vrcp.f32 %v1873_v49 }
 0x6ca   : > { %3203 = vrcp.f32 %v1874_v50  ;;  %v2408_v63 = vpop.permute.xlu1 %2407 }
 0x6cb   : > { %3205 = vpow2.f32 %v2385_v55 }
 0x6cc   : > { %3207 = vpow2.f32 %v2387_v3 }
 0x6d6   : > { %v3202_v59 = vpop.eup %3201 }
 0x6d7   : > { %v3204_v56 = vpop.eup %3203 }
 0x6d8   : > { %v3206_v58 = vpop.eup %3205 }
 0x6d9   : > { %v3208_v5 = vpop.eup %3207  ;;  %v2395_v8 = vmul.f32 0.0, %v3206_v58 }
 0x6da   : > { %v2396_v9 = vmul.f32 0.0, %v3208_v5 }
 0x6f9   : > { %v2402_v7 = vpop.xlane.xlu0 %2401 }
 0x6fa   : > { %v2404_v11 = vadd.f32 %v2402_v7, %v2396_v9 }
 0x6fb   : > { %v2399_v6 = vpop.xlane.xlu1 %2398 }
 0x6fc   : > { %v2403_v10 = vadd.f32 %v2399_v6, %v2395_v8 }
 0x6fd   : > { %v3035_v52 = vpop.f32.mrf.mxu1 }
 0x6fe   : > { %v1965_v54 = vadd.f32 %v3035_v52, %v1866_v48  ;;  %3209 = vrcp.f32 %v2403_v10 }
 0x6ff   : > { %v1955_v57 = vpop.f32.mrf.mxu1  ;;  %3211 = vrcp.f32 %v2404_v11 }
 0x700   : > { %v1964_v53 = vadd.f32 %v1955_v57, %v1865_v47  ;;  %v1969_v61 = vmul.f32 %v3204_v56, %v1965_v54 }
 0x702   : > { %v1968_v60 = vmul.f32 %v3202_v59, %v1964_v53 }
 0x704   : > { %3038 = vmatprep.mubr.msk.f32.mxu1 %vm700_vm2, %v1968_v60 }
 0x705   : > { %3039 = vmatmul.mubr.msk.f32.vlgmr.msra.gmra.mxu1 %vm700_vm2, %v1969_v61 }
 0x706   : > { %3049 = vmatpush3.msra.mxu1 %v2410_v15  ;;  %3052 = vmatprep.mubr.msk.f32.mxu1 %vm788_vm5, %v3196_v38 }
 0x707   : > { %3050 = vmatprep.subr.mxu1 %v2408_v63 }
 0x708   : > { %3051 = vmatpush3.msra.mxu1 %v2408_v63 }
 0x709   : > { %3053 = vmatmul.mubr.msk.f32.vlgmr.msra.gmra.mxu1 %vm788_vm5, %v3194_v36  ;;  %3055 = vmatprep.subr.mxu1 %v2500_v0 }
 0x70a   : > { %3056 = vmatpush3.msra.mxu1 %v2500_v0 }
 0x70b   : > { %v3210_v26 = vpop.eup %3209 }
 0x70c   : > { %v3212_v24 = vpop.eup %3211 }
 0x7c5   : > { %v3040_v12 = vpop.f32.mrf.mxu1 }
 0x7c6   : > { %v2053_v18 = vadd.f32 %v3040_v12, %v3725_v4 }
 0x7c7   : > { %v2043_v19 = vpop.f32.mrf.mxu1 }
 0x7c8   : > { %v2052_v20 = vadd.f32 %v2043_v19, %v1516_v13 }
 0x7c9   : > { %v3054_v21 = vpop.f32.mrf.mxu1 }
 0x7ca   : > { %v2495_v22 = vadd.f32 %v3054_v21, %v2396_v9 }
 0x7cb   : > { %v2485_v23 = vpop.f32.mrf.mxu1 }
 0x7cc   : > { %v2494_v27 = vadd.f32 %v2485_v23, %v2395_v8  ;;  %v2499_v28 = vmul.f32 %v3212_v24, %v2495_v22 }
 0x7ce   : > { %v2498_v25 = vmul.f32 %v3210_v26, %v2494_v27 }
 0x7d0   : > { %3057 = vmatprep.mubr.msk.f32.mxu1 %vm700_vm2, %v2498_v25 }
 0x7d1   : > { %3058 = vmatmul.mubr.msk.f32.vlgmr.msra.gmra.mxu1 %vm700_vm2, %v2499_v28 }
 0x891   : > { %v3059_v62 = vpop.f32.mrf.mxu1 }
 0x892   : > { %v2583_v4 = vadd.f32 %v3059_v62, %v2053_v18 }
 0x893   : > { %v2573_v29 = vpop.f32.mrf.mxu1 }
 0x894   : > { %2585 = vst [vmem:[%s273_s12 + $0x8] sm:$0xff] %v2583_v4  ;;  %v2582_v17 = vadd.f32 %v2573_v29, %v2052_v20 }
 0x896   : > { %2584 = vst [vmem:[%s273_s12] sm:$0xff] %v2582_v17 }
 0x897   : > { %3332 = shalt.err (!%p3329_p11)
}
 0x898   : > { %s3333_s27 = scalar_lea.hbm %s3757_s22, 256  ;;  %s3337_s29 = scalar_lea.hbm %s3809_s4, 512 }
 0x899   : > { %p3334_p10 = scmp.ne.s32.totalorder %s3757_s22, %s3333_s27  ;;  %p3338_p12 = scmp.lt.s32.totalorder %s3757_s22, %s3809_s4 }
 0x89a   : > { %p3339_p9 = scmp.lt.s32.totalorder %s3337_s29, %s3333_s27 }
 0x89b   : > { %p3335_p7 = pnand %p3334_p10, %p3823_p4 }
 0x89c   : > { %p3340_p5 = por %p3339_p9, %p3338_p12 }
 0x89d   : > { %p3336_p6 = pneg %p3335_p7 }
 0x89f   : > { %p3341_p1 = pnand %p3340_p5, %p3336_p6 }
 0x8a1   : > { %3344 = shalt.err (!%p3341_p1)
}
 0x8a2   : > { %s3424_s13 = smov 128   ;;  %s3425_s8 = smov 8  }
 0x8a3   : > { %3074 = dma.vmem_to_hbm [thread:$0]  (%p3823_p4), %s3752_s6, 256, %s3757_s22, %s2587_s28, %s3424_s13, %s3424_s13, %s3425_s8  }
 0x8a4 PF: > { %s2617_s21 = sand.u32 1, %s3387_s15   ;;  %p3824_p8 = scmp.ne.s32.totalorder %s3816_s26, 0 }
 0x8a5   : > { %p3825_p13 = scmp.ge.s32.totalorder %s3407_s20, 2  ;;  %s2618_s11 = scalar_lea.sflag [#allocation5], %s2617_s21 }
 0x8a7   : > { %p3091_p0 = pnand %p3825_p13, %p3824_p8 }
 0x8a9   : > { %p3092_p3 = pneg %p3091_p0 }
 0x8ab   : > { %3382 = dma.done.wait (%p3092_p3), %s2618_s11, 256  }
 0x8ac   : > { %3384 = vsyncadd (%p3092_p3), %s2618_s11, 4294967040  ;;  %s22_s20 = sadd.s32 1, %s3407_s20   ;;  %s3826_s15 = smov %s3391_s16 }
 0x8ad   : > { %p19_p2 = scmp.ge.s32.totalorder %s22_s20, 4   ;;  %s3827_s16 = smov %s3395_s17 }
 0x8ae   : > { %s3828_s17 = smov %s3572_s14  ;;  %s3829_s18 = smov %s3403_s19 }
 0x8af   : > { %s3830_s19 = smov %s3832_s30  ;;  %21 = sbr.rel (!%p19_p2) target bundleno = 8 (0x8), region = 175 }
 0x8b4   :  { %2623 = vsyncpa [#allocation4], 1 }
 0x8b5   :  { %2625 = vsyncpa [#allocation4 + $0x1], 1 }
 0x8b6   :  { %2626 = vsyncpa [#allocation7], 1 }
 0x8b7   :  { %2627 = vsyncpa [#allocation10], 1 }
 0x8b8   :  { %2628 = vsyncpa [#allocation5], 1 }
 0x8b9   :  { %2630 = vsyncpa [#allocation5 + $0x1], 1 }

// kernel: tpu_custom_call.1
= control target key start
LH: loop header
LB: loop body
LE: loop exit
PB: predicated region body
PF: predicated region fallthrough
CT: control target
= control target key end

     0   :  { %9 = vsyncpa [#allocation4], 0  ;;  %s3805_s0 = inlined_call_operand.hbm [shape: f32[2,16,32], index: 0, kind: input, shape index: {}]   ;;  %s3806_s1 = inlined_call_operand.hbm [shape: f32[32,32], index: 1, kind: input, shape index: {}]   ;;  %s3807_s2 = inlined_call_operand.hbm [shape: f32[32,64], index: 2, kind: input, shape index: {}]   ;;  %s3808_s3 = inlined_call_operand.hbm [shape: f32[32,128], index: 3, kind: input, shape index: {}]   ;;  %s3809_s4 = inlined_call_operand.hbm [shape: f32[2,16,128], index: 4, kind: output, shape index: {}]  }
   0x1   :  { %11 = vsyncpa [#allocation4 + $0x1], 0 }
   0x2   :  { %12 = vsyncpa [#allocation7], 0 }
   0x3   :  { %13 = vsyncpa [#allocation10], 0 }
   0x4   :  { %14 = vsyncpa [#allocation5], 0 }
   0x5   :  { %16 = vsyncpa [#allocation5 + $0x1], 0  ;;  %s3451_s15 = smov 0   ;;  %s3453_s16 = smov 0  }
   0x6   :  { %s3455_s17 = smov 0   ;;  %s3457_s18 = smov 0  }
   0x7   :  { %s3459_s19 = smov 0   ;;  %s3461_s20 = smov 0  }
   0x8 LB: > { %s2819_s21 = sadd.s32 4294967295, %s3407_s20   ;;  %s2820_s22 = sadd.s32 4294967294, %s3407_s20   ;;  %s3407_s20 = sphi %s3461_s20, %s22_s20   ;;  %s3403_s19 = sphi %s3459_s19, %s3830_s19   ;;  %s3399_s18 = sphi %s3457_s18, %s3829_s18   ;;  %s3395_s17 = sphi %s3455_s17, %s3828_s17   ;;  %s3391_s16 = sphi %s3453_s16, %s3827_s16   ;;  %s3387_s15 = sphi %s3451_s15, %s3826_s15  }
   0x9   : > { %p54_p0 = scmp.ne.s32.totalorder %s3391_s16, %s3387_s15  ;;  %p3485_p1 = scmp.eq.s32.totalorder %s2819_s21, 0 }
   0xa   : > { %p3489_p2 = scmp.eq.s32.totalorder %s2819_s21, 1  ;;  %p149_p3 = scmp.eq.s32.totalorder %s2820_s22, 1 }
   0xb   : > { %p3495_p4 = por %p3485_p1, %p54_p0  ;;  %p2821_p5 = scmp.ge.s32.totalorder %s3407_s20, 1 }
   0xc   : > { %p3500_p6 = por %p149_p3, %p54_p0  ;;  %p156_p7 = scmp.lt.s32.totalorder %s3407_s20, 3 }
   0xd   : > { %s3409_s28 = smov [#allocation6]   ;;  %s3410_s5 = smov [#allocation8]  }
   0xe   : > { %s3816_s26 = scalar_select %p3500_p6, 1, 0 }
   0xf   : > { %p3505_p8 = pnand %p2821_p5, %p156_p7  ;;  %s168_s29 = sshll.u32 %s3409_s28, 4  ;;  %s169_s29 = int_to_ptr.vmem [resolvable:$true] %s168_s29 }
  0x10   : > { %s181_s6 = sshll.u32 %s3410_s5, 4  ;;  %s3411_s7 = smov [#allocation9]   ;;  %s182_s6 = int_to_ptr.vmem [resolvable:$true] %s181_s6 }
  0x11   : > { %p3076_p9 = pneg %p3505_p8  ;;  %s194_s8 = sshll.u32 %s3411_s7, 4  ;;  %s195_s8 = int_to_ptr.vmem [resolvable:$true] %s194_s8 }
  0x12   : > { %s3224_s9 = scalar_lea.vmem %s169_s29, 512  ;;  %p3232_p5 = scmp.lt.s32.totalorder %s169_s29, %s169_s29 }
  0x13   : > { %p3514_p11 = pnand %p3076_p9, %p3485_p1  ;;  %p3225_p13 = scmp.ne.s32.totalorder %s169_s29, %s3224_s9 }
  0x14   : > { %p3233_p7 = scmp.lt.s32.totalorder %s3224_s9, %s3224_s9 }
  0x15   : > { %p3215_p12 = pneg %p3514_p11 }
  0x16   : > { %p3234_p9 = por %p3233_p7, %p3232_p5 }
  0x17   : > { %p3227_p0 = pnand %p3225_p13, %p3215_p12 }
  0x19   : > { %p3228_p3 = pneg %p3227_p0 }
  0x1b   : > { %p3235_p10 = pnand %p3234_p9, %p3228_p3 }
  0x1d   : > { %3238 = shalt.err (!%p3235_p10)
}
  0x1e   : > { %s3810_s10 = smov 128   ;;  %s3811_s11 = smov 8  }
  0x1f   : > { %3079 = dma.hbm_to_vmem [thread:$0]  (!%p3514_p11), %s3806_s1, 512, %s169_s29, [#allocation7], %s3810_s10, %s3810_s10, %s3811_s11  }
  0x20   : > { %s3250_s14 = scalar_lea.vmem %s182_s6, 512  ;;  %p3258_p3 = scmp.lt.s32.totalorder %s182_s6, %s182_s6 }
  0x21   : > { %p3251_p13 = scmp.ne.s32.totalorder %s182_s6, %s3250_s14  ;;  %p3259_p10 = scmp.lt.s32.totalorder %s3250_s14, %s3250_s14 }
  0x23   : > { %p3253_p0 = pnand %p3251_p13, %p3215_p12  ;;  %p3260_p7 = por %p3259_p10, %p3258_p3 }
  0x25   : > { %p3254_p5 = pneg %p3253_p0 }
  0x27   : > { %p3261_p9 = pnand %p3260_p7, %p3254_p5 }
  0x29   : > { %3264 = shalt.err (!%p3261_p9)
}
  0x2a   : > { %3082 = dma.hbm_to_vmem [thread:$0]  (!%p3514_p11), %s3807_s2, 512, %s182_s6, [#allocation7], %s3810_s10, %s3810_s10, %s3811_s11  }
  0x2b   : > { %s3276_s28 = scalar_lea.vmem %s195_s8, 512  ;;  %p3284_p3 = scmp.lt.s32.totalorder %s195_s8, %s195_s8 }
  0x2c   : > { %p3277_p6 = scmp.ne.s32.totalorder %s195_s8, %s3276_s28  ;;  %p3285_p5 = scmp.lt.s32.totalorder %s3276_s28, %s3276_s28 }
  0x2e   : > { %p3279_p13 = pnand %p3277_p6, %p3215_p12  ;;  %p3286_p10 = por %p3285_p5, %p3284_p3 }
  0x30   : > { %p3280_p0 = pneg %p3279_p13 }
  0x32   : > { %p3287_p7 = pnand %p3286_p10, %p3280_p0 }
  0x34   : > { %3290 = shalt.err (!%p3287_p7)
}
  0x35   : > { %3085 = dma.hbm_to_vmem [thread:$0]  (!%p3514_p11), %s3808_s3, 512, %s195_s8, [#allocation10], %s3810_s10, %s3810_s10, %s3811_s11  }
  0x36   : > { %s41_s6 = sadd.s32 1, %s3395_s17  ;;  %s34_s30 = sadd.s32 1, %s3403_s19 }
  0x37   : > { %p48_p6 = scmp.ne.s32.totalorder %s3395_s17, %s3391_s16  ;;  %p36_p12 = scmp.ge.s32.totalorder %s34_s30, 2 }
  0x38   : > { %p49_p9 = scmp.eq.s32.totalorder %s3407_s20, 0  ;;  %p3097_p0 = scmp.lt.s32.totalorder %s3407_s20, 2 }
  0x39   : > { %p3560_p13 = por %p3489_p2, %p48_p6  ;;  %s3832_s30 = smov (%p36_p12, %s34_s30), 0 }
  0x3a   : > { %p50_p3 = por %p49_p9, %p48_p6  ;;  %s208_s9 = sand.u32 1, %s3395_s17  }
  0x3b   : > { %s3819_s7 = scalar_select %p3560_p13, 1, 0 }
  0x3c   : > { %s38_s12 = ssub.s32 %s3403_s19, %s3832_s30  ;;  %s2826_s8 = sshll.u32 %s208_s9, 4 }
  0x3d   : > { %p39_p5 = scmp.eq.s32.totalorder %s38_s12, 0  ;;  %s2904_s13 = sshll.u32 %s3403_s19, 8 }
  0x3e   : > { %s218_s24 = scalar_lea.hbm %s3805_s0, %s2904_s13  ;;  %s212_s28 = scalar_lea.vmem [#allocation3], %s2826_s8 }
  0x3f   : > { %s3572_s14 = scalar_select %p39_p5, %s3395_s17, %s41_s6  }
  0x40   : > { %s219_s29 = sshll.u32 %s212_s28, 4  ;;  %p3579_p2 = pnand %p3097_p0, %p50_p3  ;;  %s220_s29 = int_to_ptr.vmem [resolvable:$true] %s219_s29 }
  0x41   : > { %s209_s10 = scalar_lea.sflag [#allocation4], %s208_s9  ;;  %s3304_s12 = scalar_lea.vmem %s220_s29, 256 }
  0x42   : > { %p3293_p11 = pneg %p3579_p2  ;;  %p3305_p10 = scmp.ne.s32.totalorder %s220_s29, %s3304_s12 }
  0x43   : > { %s3414_s6 = smov [#allocation3]  }
  0x44   : > { %p3307_p7 = pnand %p3305_p10, %p3293_p11  ;;  %s3309_s11 = sshll.u32 %s3414_s6, 4  ;;  %s3310_s11 = int_to_ptr.vmem [resolvable:$false] %s3309_s11 }
  0x45   : > { %s3311_s13 = scalar_lea.vmem %s3310_s11, 512  ;;  %p3312_p12 = scmp.lt.s32.totalorder %s220_s29, %s3310_s11 }
  0x46   : > { %p3308_p6 = pneg %p3307_p7  ;;  %p3313_p9 = scmp.lt.s32.totalorder %s3311_s13, %s3304_s12 }
  0x48   : > { %p3314_p5 = por %p3313_p9, %p3312_p12 }
  0x4a   : > { %p3315_p13 = pnand %p3314_p5, %p3308_p6 }
  0x4c   : > { %3318 = shalt.err (!%p3315_p13)
}
  0x4d   : > { %s3821_s8 = smov 8   ;;  %s3822_s21 = smov 128  }
  0x4e   : > { %3089 = dma.hbm_to_vmem [thread:$0]  (!%p3579_p2), %s218_s24, 256, %s220_s29, %s209_s10, %s3822_s21, %s3822_s21, %s3821_s8  }
  0x4f   : > { %231 = sbr.rel (%p3505_p8) target bundleno = 2212 (0x8a4), region = 36  ;;  %s3593_s9 = sand.u32 (!%p3505_p8), 1, %s3391_s16  }
  0x50   : > { %s2830_s11 = sshll.u32 (!%p3505_p8), %s3593_s9, 4  ;;  %s234_s22 = scalar_lea.sflag (!%p3505_p8), [#allocation4], %s3593_s9 }
  0x51   : > { %s237_s28 = scalar_lea.vmem (!%p3505_p8), [#allocation3], %s2830_s11 }
  0x54   : > { %3370 = dma.done.wait (%p3495_p4), %s234_s22, 256  }
  0x55   : > { %3372 = vsyncadd (%p3495_p4), %s234_s22, 4294967040 }
  0x56   : > { %3374 = dma.done.wait (%p3485_p1), [#allocation7], 1024  }
  0x57   : > { %3376 = vsyncadd (%p3485_p1), [#allocation7], 4294966272 }
  0x58   : > { %3378 = dma.done.wait (%p3485_p1), [#allocation10], 512  }
  0x59   : > { %3380 = vsyncadd (%p3485_p1), [#allocation10], 4294966784  ;;  %vm285_vm0 = vcmask 261120   ;;  %v284_v0 = vld [vmem:[#allocation8 + $0x18] sm:$0xff]  ;;  %v283_v1 = vld [vmem:[#allocation8 + $0x10] sm:$0xff]  ;;  %vm367_vm1 = vcmask 523264   ;;  %v462_v20 = vlaneseq }
  0x5a   : > { %2962 = vmatprep.subr.mxu0 %v284_v0  ;;  %v279_v2 = vld [vmem:[%s237_s28] sm:$0xff]  ;;  %v282_v3 = vld [vmem:[#allocation8 + $0x8] sm:$0xff]  ;;  %v377_v4 = vld [vmem:[#allocation6 + $0x18] sm:$0xff]  ;;  %vm700_vm2 = vcmask 64512   ;;  %s3415_s23 = smov 96   ;;  %s3416_s25 = smov 120  }
  0x5b   : > { %2963 = vmatpush3.msra.mxu0 %v284_v0  ;;  %2970 = vmatprep.mubr.msk.f32.mxu0 %vm285_vm0, %v279_v2  ;;  %v376_v5 = vld [vmem:[#allocation6 + $0x10] sm:$0xff]  ;;  %v281_v6 = vld [vmem:[#allocation8] sm:$0xff]  ;;  %v375_v7 = vld [vmem:[#allocation6 + $0x8] sm:$0xff]  ;;  %v463_v21 = vshrl.u32 %v462_v20, 7  ;;  %v466_v23 = vand.u32 127, %v462_v20  ;;  %v3417_v25 = vmov 0.0  }
  0x5c   : > { %2964 = vmatprep.subr.mxu0 %v283_v1  ;;  %2973 = vmatprep.subr.mxu1 %v377_v4  ;;  %v280_v8 = vld [vmem:[%s237_s28 + $0x8] sm:$0xff]  ;;  %v374_v9 = vld [vmem:[#allocation6] sm:$0xff]  ;;  %vm788_vm5 = vcmask 130048   ;;  %s3418_s27 = smov 88   ;;  %s3419_s10 = smov 112  }
  0x5d   : > { %2965 = vmatpush3.msra.mxu0 %v283_v1  ;;  %2974 = vmatpush3.msra.mxu1 %v377_v4  ;;  %v464_v22 = vadd.s32 8, %v463_v21  ;;  %vm467_vm3 = vcmp.gt.s32.totalorder %v466_v23, %v463_v21  ;;  %s3420_s24 = smov 104   ;;  %s3421_s29 = smov 80  }
  0x5e   : > { %2966 = vmatprep.subr.mxu0 %v282_v3  ;;  %2975 = vmatprep.subr.mxu1 %v376_v5  ;;  %v3640_v26 = vsel %vm467_vm3, -1e+30, %v3417_v25  ;;  %s3422_s5 = smov 72   ;;  %s273_s12 = scalar_lea.vmem [#allocation11], %s2830_s11 }
  0x5f   : > { %2967 = vmatpush3.msra.mxu0 %v282_v3  ;;  %2976 = vmatpush3.msra.mxu1 %v376_v5  ;;  %vm468_vm4 = vcmp.gt.s32.totalorder %v466_v23, %v464_v22  ;;  %v914_v23 = vld [vmem:[#allocation9] sm:$0xff]  ;;  %s2602_s6 = sshll.u32 %s273_s12, 4  ;;  %s2905_s13 = sshll.u32 %s3399_s18, 8  ;;  %s3752_s6 = int_to_ptr.vmem [resolvable:$true] %s2602_s6 }
  0x60   : > { %2968 = vmatprep.subr.mxu0 %v281_v6  ;;  %2977 = vmatprep.subr.mxu1 %v375_v7  ;;  %v3642_v27 = vsel %vm468_vm4, -1e+30, %v3417_v25  ;;  %s3757_s22 = scalar_lea.hbm %s3809_s4, %s2905_s13  ;;  %s2587_s28 = scalar_lea.sflag [#allocation5], %s3593_s9 }
  0x61   : > { %2969 = vmatpush3.msra.mxu0 %v281_v6  ;;  %2978 = vmatpush3.msra.mxu1 %v375_v7  ;;  %s3319_s11 = scalar_lea.vmem %s3752_s6, 256  ;;  %p3823_p4 = scmp.ne.s32.totalorder %s3819_s7, 0 }
  0x62   : > { %2971 = vmatmul.mubr.msk.f32.vlgmr.msra.gmra.mxu0 %vm285_vm0, %v280_v8  ;;  %2979 = vmatprep.subr.mxu1 %v374_v9  ;;  %p3320_p1 = scmp.ne.s32.totalorder %s3752_s6, %s3319_s11  ;;  %s3423_s18 = smov [#allocation11]  }
  0x63   : > { %2980 = vmatpush3.msra.mxu1 %v374_v9  ;;  %2981 = vmatprep.mubr.msk.f32.mxu1 %vm285_vm0, %v279_v2 }
  0x64   : > { %2982 = vmatmul.mubr.msk.f32.vlgmr.msra.gmra.mxu1 %vm285_vm0, %v280_v8  ;;  %p3321_p8 = pnand %p3320_p1, %p3823_p4 }
  0x66   : > { %p3322_p13 = pneg %p3321_p8 }
 0x122   : > { %v2972_v10 = vpop.f32.mrf.mxu0 }
 0x123   : > { %369 = vst.msk [vmem:[#allocation2 + $0x8] sm:$0xff] %vm367_vm1, %v2972_v10 }
 0x124   : > { %v358_v11 = vpop.f32.mrf.mxu0  ;;  %v2983_v12 = vpop.f32.mrf.mxu1 }
 0x125   : > { %368 = vst.msk [vmem:[#allocation2] sm:$0xff] %vm367_vm1, %v358_v11  ;;  %v3633_v17 = vmul.f32 0.35355338, %v2983_v12  ;;  %v1361_v11 = vld [vmem:[#allocation9 + $0x8] sm:$0xff] }
 0x126   : > { %v451_v13 = vpop.f32.mrf.mxu1 }
 0x127   : > { %v3615_v14 = vmul.f32 0.35355338, %v451_v13 }
 0x129   : > { %2988 = vmatprep.mubr.msk.f32.mxu0 %vm700_vm2, %v3615_v14 }
 0x12a   : > { %v3619_v15 = vld [vmem:[#allocation2 + $0x8] sm:$0xff] }
 0x12b   : > { %823 = vrot.lane.b32.xlu1 %v3619_v15, %s3415_s23  ;;  %2984 = vmatprep.subr.msk.mxu0 %vm700_vm2, %v3619_v15 }
 0x12c   : > { %2985 = vmatpush3.xpose.msk.msra.mxu0 %vm700_vm2, %v3619_v15  ;;  %v3626_v16 = vld [vmem:[#allocation2] sm:$0xff] }
 0x12d   : > { %2986 = vmatprep.subr.msk.mxu0 %vm700_vm2, %v3626_v16 }
 0x12f   : > { %821 = vrot.lane.b32.xlu1 %v3626_v16, %s3415_s23  ;;  %s3323_s23 = sshll.u32 %s3423_s18, 4  ;;  %s3324_s23 = int_to_ptr.vmem [resolvable:$false] %s3323_s23 }
 0x130   : > { %2987 = vmatpush3.xpose.msk.msra.mxu0 %vm700_vm2, %v3626_v16  ;;  %p3326_p0 = scmp.lt.s32.totalorder %s3752_s6, %s3324_s23 }
 0x133   : > { %1149 = vrot.lane.b32.xlu1 %v3626_v16, %s3416_s25  ;;  %2989 = vmatmul.mubr.msk.f32.vlgmr.msra.gmra.mxu0 %vm700_vm2, %v3633_v17 }
 0x137   : > { %1145 = vrot.lane.b32.xlu1 %v3615_v14, %s3416_s25 }
 0x13b   : > { %1147 = vrot.lane.b32.xlu1 %v3633_v17, %s3416_s25 }
 0x19d   : > { %v824_v18 = vpop.permute.xlu1 %823 }
 0x19e   : > { %2991 = vmatprep.subr.mxu1 %v824_v18 }
 0x19f   : > { %2992 = vmatpush3.msra.mxu1 %v824_v18 }
 0x1a1   : > { %v822_v19 = vpop.permute.xlu1 %821 }
 0x1a2   : > { %2993 = vmatprep.subr.mxu1 %v822_v19 }
 0x1a3   : > { %2994 = vmatpush3.msra.mxu1 %v822_v19 }
 0x1a5   : > { %v1150_v42 = vpop.permute.xlu1 %1149 }
 0x1a9   : > { %v1146_v45 = vpop.permute.xlu1 %1145 }
 0x1ad   : > { %v1148_v46 = vpop.permute.xlu1 %1147 }
 0x1f3   : > { %v2990_v24 = vpop.f32.mrf.mxu0 }
 0x1f4   : > { %v785_v30 = vadd.f32 %v2990_v24, %v3642_v27 }
 0x1f5   : > { %v779_v28 = vpop.f32.mrf.mxu0 }
 0x1f6   : > { %v780_v29 = vadd.f32 %v779_v28, %v3640_v26  ;;  %v792_v32 = vsel %vm788_vm5, %v785_v30, -inf }
 0x1f8   : > { %v789_v31 = vsel %vm788_vm5, %v780_v29, -inf }
 0x1f9   : > { %790 = vmax.xlane.f32.xlu0 %v789_v31 }
 0x1fd   : > { %793 = vmax.xlane.f32.xlu0 %v792_v32 }
 0x213   : > { %1151 = vrot.lane.b32.xlu0 %v3619_v15, %s3416_s25  ;;  %s3325_s25 = scalar_lea.vmem %s3324_s23, 512 }
 0x214   : > { %p3327_p3 = scmp.lt.s32.totalorder %s3325_s25, %s3319_s11 }
 0x216   : > { %p3328_p2 = por %p3327_p3, %p3326_p0 }
 0x218   : > { %p3329_p11 = pnand %p3328_p2, %p3322_p13 }
 0x282   : > { %v791_v33 = vpop.xlane.xlu0 %790 }
 0x283   : > { %v795_v34 = vmax.f32 %v791_v33, -1e+30 }
 0x285   : > { %v803_v35 = vsub.f32 %v780_v29, %v795_v34  ;;  %v797_v48 = vsub.f32 -1e+30, %v795_v34 }
 0x286   : > { %v794_v36 = vpop.xlane.xlu0 %793 }
 0x287   : > { %v805_v37 = vmul.f32 1.442695, %v803_v35  ;;  %v796_v38 = vmax.f32 %v794_v36, -1e+30  ;;  %v799_v50 = vmul.f32 1.442695, %v797_v48 }
 0x289   : > { %v804_v39 = vsub.f32 %v785_v30, %v796_v38  ;;  %3165 = vpow2.f32 %v805_v37  ;;  %v798_v47 = vsub.f32 -1e+30, %v796_v38 }
 0x28a   : > { %v1152_v40 = vpop.permute.xlu0 %1151 }
 0x28b   : > { %v807_v41 = vmul.f32 1.442695, %v804_v39  ;;  %2998 = vmatprep.subr.msk.mxu1 %vm700_vm2, %v1152_v40  ;;  %v801_v49 = vmul.f32 1.442695, %v798_v47 }
 0x28d   : > { %3167 = vpow2.f32 %v807_v41 }
 0x28e   : > { %3169 = vpow2.f32 %v801_v49 }
 0x28f   : > { %3171 = vpow2.f32 %v799_v50 }
 0x296   : > { %v3650_v43 = vpop.eup %3165 }
 0x297   : > { %2995 = vmatprep.mubr.msk.f32.mxu1 %vm788_vm5, %v3650_v43  ;;  %v811_v22 = vsel %vm788_vm5, %v3650_v43, 0.0 }
 0x29a   : > { %v3654_v44 = vpop.eup %3167 }
 0x29b   : > { %2996 = vmatmul.mubr.msk.f32.vlgmr.msra.gmra.mxu1 %vm788_vm5, %v3654_v44  ;;  %v3170_v51 = vpop.eup %3169  ;;  %v814_v21 = vsel %vm788_vm5, %v3654_v44, 0.0 }
 0x29c   : > { %2999 = vmatpush3.xpose.msk.msra.mxu1 %vm700_vm2, %v1152_v40  ;;  %3002 = vmatprep.mubr.msk.f32.mxu1 %vm700_vm2, %v1146_v45  ;;  %v3172_v52 = vpop.eup %3171  ;;  %v3663_v53 = vmul.f32 0.0, %v3170_v51 }
 0x29d   : > { %3000 = vmatprep.subr.msk.mxu1 %vm700_vm2, %v1150_v42  ;;  %v3668_v56 = vmul.f32 0.0, %v3172_v52 }
 0x2a0   : > { %3001 = vmatpush3.xpose.msk.msra.mxu1 %vm700_vm2, %v1150_v42 }
 0x2a1   : > { %3017 = vmatprep.subr.mxu1 %v914_v23 }
 0x2a3   : > { %3003 = vmatmul.mubr.msk.f32.vlgmr.msra.gmra.mxu1 %vm700_vm2, %v1148_v46 }
 0x2a4   : > { %3018 = vmatpush3.msra.mxu1 %v914_v23 }
 0x35b   : > { %v2997_v54 = vpop.f32.mrf.mxu1 }
 0x35c   : > { %v3666_v55 = vadd.f32 %v2997_v54, %v3663_v53 }
 0x35d   : > { %v899_v57 = vpop.f32.mrf.mxu1 }
 0x35e   : > { %v3671_v58 = vadd.f32 %v899_v57, %v3668_v56 }
 0x363   : > { %v3004_v59 = vpop.f32.mrf.mxu1 }
 0x364   : > { %v1233_v60 = vadd.f32 %v3004_v59, %v3642_v27 }
 0x365   : > { %v1227_v61 = vpop.f32.mrf.mxu1 }
 0x366   : > { %v1228_v62 = vadd.f32 %v1227_v61, %v3640_v26  ;;  %v1239_v63 = vsel %vm788_vm5, %v1233_v60, -inf }
 0x367   : > { %1240 = vmax.xlane.f32.xlu0 %v1239_v63 }
 0x368   : > { %v1236_v0 = vsel %vm788_vm5, %v1228_v62, -inf }
 0x369   : > { %1237 = vmax.xlane.f32.xlu1 %v1236_v0 }
 0x37a   : > { %1270 = vrot.lane.b32.xlu1 %v3619_v15, %s3418_s27 }
 0x37d   : > { %1268 = vrot.lane.b32.xlu0 %v3626_v16, %s3418_s27 }
 0x37e   : > { %1760 = vrot.lane.b32.xlu1 %v3619_v15, %s3419_s10 }
 0x3f0   : > { %v1241_v1 = vpop.xlane.xlu0 %1240 }
 0x3f1   : > { %v1243_v2 = vmax.f32 %v1241_v1, -1e+30 }
 0x3f2   : > { %v1238_v3 = vpop.xlane.xlu1 %1237 }
 0x3f3   : > { %v1251_v4 = vsub.f32 %v1233_v60, %v1243_v2  ;;  %v1242_v5 = vmax.f32 %v1238_v3, -1e+30  ;;  %v1245_v25 = vsub.f32 -1e+30, %v1243_v2 }
 0x3f4   : > { %v1269_v10 = vpop.permute.xlu0 %1268 }
 0x3f5   : > { %v1254_v6 = vmul.f32 1.442695, %v1251_v4  ;;  %v1250_v7 = vsub.f32 %v1228_v62, %v1242_v5  ;;  %v1244_v24 = vsub.f32 -1e+30, %v1242_v5  ;;  %v1248_v29 = vmul.f32 1.442695, %v1245_v25 }
 0x3f6   : > { %v1271_v8 = vpop.permute.xlu1 %1270 }
 0x3f7   : > { %v1252_v9 = vmul.f32 1.442695, %v1250_v7  ;;  %3005 = vmatprep.subr.mxu0 %v1271_v8  ;;  %3173 = vpow2.f32 %v1254_v6  ;;  %v1246_v28 = vmul.f32 1.442695, %v1244_v24 }
 0x3f8   : > { %3006 = vmatpush3.msra.mxu0 %v1271_v8 }
 0x3f9   : > { %3007 = vmatprep.subr.mxu0 %v1269_v10  ;;  %3175 = vpow2.f32 %v1252_v9 }
 0x3fa   : > { %3008 = vmatpush3.msra.mxu0 %v1269_v10  ;;  %v1761_v20 = vpop.permute.xlu1 %1760  ;;  %3177 = vpow2.f32 %v1246_v28 }
 0x3fb   : > { %3012 = vmatprep.subr.mxu0 %v1361_v11  ;;  %3179 = vpow2.f32 %v1248_v29  ;;  %v1970_v29 = vld [vmem:[#allocation9 + $0x10] sm:$0xff] }
 0x404   : > { %v3174_v12 = vpop.eup %3173 }
 0x405   : > { %v1261_v13 = vsel %vm788_vm5, %v3174_v12, 0.0 }
 0x406   : > { %v3176_v18 = vpop.eup %3175  ;;  %1262 = vadd.xlane.f32.xlu0 %v1261_v13 }
 0x407   : > { %3009 = vmatprep.mubr.msk.f32.mxu0 %vm788_vm5, %v3176_v18  ;;  %v1258_v19 = vsel %vm788_vm5, %v3176_v18, 0.0  ;;  %v3178_v30 = vpop.eup %3177 }
 0x408   : > { %1259 = vadd.xlane.f32.xlu1 %v1258_v19  ;;  %3010 = vmatmul.mubr.msk.f32.vlgmr.msra.gmra.mxu0 %vm788_vm5, %v3174_v12  ;;  %v3180_v31 = vpop.eup %3179  ;;  %v1256_v32 = vmul.f32 0.0, %v3178_v30 }
 0x409   : > { %3013 = vmatpush3.msra.mxu0 %v1361_v11  ;;  %v1257_v33 = vmul.f32 0.0, %v3180_v31 }
 0x40a   : > { %3022 = vmatprep.subr.msk.mxu0 %vm700_vm2, %v1761_v20 }
 0x419   : > { %1754 = vrot.lane.b32.xlu1 %v3615_v14, %s3419_s10 }
 0x41c   : > { %1758 = vrot.lane.b32.xlu0 %v3626_v16, %s3419_s10 }
 0x41d   : > { %1756 = vrot.lane.b32.xlu1 %v3633_v17, %s3419_s10 }
 0x420   : > { %2288 = vrot.lane.b32.xlu0 %v3626_v16, %s3420_s24 }
 0x421   : > { %2290 = vrot.lane.b32.xlu1 %v3619_v15, %s3420_s24 }
 0x424   : > { %2286 = vrot.lane.b32.xlu0 %v3633_v17, %s3420_s24 }
 0x425   : > { %2284 = vrot.lane.b32.xlu1 %v3615_v14, %s3420_s24 }
 0x443   : > { %815 = vadd.xlane.f32.xlu0 %v814_v21 }
 0x449   : > { %812 = vadd.xlane.f32.xlu1 %v811_v22 }
 0x48f   : > { %v1263_v17 = vpop.xlane.xlu0 %1262 }
 0x490   : > { %v1265_v36 = vadd.f32 %v1263_v17, %v1257_v33 }
 0x491   : > { %v1260_v14 = vpop.xlane.xlu1 %1259 }
 0x492   : > { %v1264_v34 = vadd.f32 %v1260_v14, %v1256_v32 }
 0x493   : > { %v1759_v35 = vpop.permute.xlu0 %1758 }
 0x494   : > { %3181 = vrcp.f32 %v1264_v34 }
 0x495   : > { %v1755_v37 = vpop.permute.xlu1 %1754  ;;  %3183 = vrcp.f32 %v1265_v36 }
 0x497   : > { %v2289_v38 = vpop.permute.xlu0 %2288 }
 0x499   : > { %v1757_v39 = vpop.permute.xlu1 %1756 }
 0x49b   : > { %v2287_v40 = vpop.permute.xlu0 %2286 }
 0x49d   : > { %v2291_v41 = vpop.permute.xlu1 %2290 }
 0x4a1   : > { %v3182_v46 = vpop.eup %3181  ;;  %v2285_v51 = vpop.permute.xlu1 %2284 }
 0x4a2   : > { %v3184_v48 = vpop.eup %3183 }
 0x4c8   : > { %v3011_v42 = vpop.f32.mrf.mxu0 }
 0x4c9   : > { %v1356_v43 = vadd.f32 %v3011_v42, %v1257_v33 }
 0x4ca   : > { %v1346_v44 = vpop.f32.mrf.mxu0 }
 0x4cb   : > { %v1355_v45 = vadd.f32 %v1346_v44, %v1256_v32  ;;  %v1360_v52 = vmul.f32 %v3184_v48, %v1356_v43 }
 0x4cc   : > { %v816_v47 = vpop.xlane.xlu0 %815 }
 0x4cd   : > { %v1359_v49 = vmul.f32 %v3182_v46, %v1355_v45  ;;  %v818_v50 = vadd.f32 %v816_v47, %v3663_v53 }
 0x4cf   : > { %3185 = vrcp.f32 %v818_v50  ;;  %3014 = vmatprep.mubr.msk.f32.mxu0 %vm700_vm2, %v1359_v49 }
 0x4d0   : > { %3015 = vmatmul.mubr.msk.f32.vlgmr.msra.gmra.mxu0 %vm700_vm2, %v1360_v52 }
 0x4d1   : > { %3023 = vmatpush3.xpose.msk.msra.mxu0 %vm700_vm2, %v1761_v20  ;;  %3026 = vmatprep.mubr.msk.f32.mxu0 %vm700_vm2, %v1755_v37 }
 0x4d2   : > { %3024 = vmatprep.subr.msk.mxu0 %vm700_vm2, %v1759_v35  ;;  %v813_v54 = vpop.xlane.xlu1 %812 }
 0x4d3   : > { %v817_v57 = vadd.f32 %v813_v54, %v3668_v56 }
 0x4d5   : > { %3187 = vrcp.f32 %v817_v57  ;;  %3025 = vmatpush3.xpose.msk.msra.mxu0 %vm700_vm2, %v1759_v35 }
 0x4d6   : > { %3041 = vmatprep.subr.msk.mxu0 %vm700_vm2, %v2291_v41 }
 0x4d8   : > { %3027 = vmatmul.mubr.msk.f32.vlgmr.msra.gmra.mxu0 %vm700_vm2, %v1757_v39 }
 0x4d9   : > { %3042 = vmatpush3.xpose.msk.msra.mxu0 %vm700_vm2, %v2291_v41  ;;  %3045 = vmatprep.mubr.msk.f32.mxu0 %vm700_vm2, %v2285_v51 }
 0x4da   : > { %3043 = vmatprep.subr.msk.mxu0 %vm700_vm2, %v2289_v38 }
 0x4dc   : > { %v3186_v53 = vpop.eup %3185 }
 0x4dd   : > { %3044 = vmatpush3.xpose.msk.msra.mxu0 %vm700_vm2, %v2289_v38  ;;  %v913_v59 = vmul.f32 %v3186_v53, %v3666_v55 }
 0x4e0   : > { %3046 = vmatmul.mubr.msk.f32.vlgmr.msra.gmra.mxu0 %vm700_vm2, %v2287_v40 }
 0x4e2   : > { %v3188_v56 = vpop.eup %3187 }
 0x4e3   : > { %v912_v60 = vmul.f32 %v3188_v56, %v3671_v58 }
 0x4e5   : > { %3019 = vmatprep.mubr.msk.f32.mxu1 %vm700_vm2, %v912_v60 }
 0x4e6   : > { %3020 = vmatmul.mubr.msk.f32.vlgmr.msra.gmra.mxu1 %vm700_vm2, %v913_v59 }
 0x590   : > { %v3016_v61 = vpop.f32.mrf.mxu0 }
 0x592   : > { %v3719_v62 = vpop.f32.mrf.mxu0 }
 0x598   : > { %v3028_v63 = vpop.f32.mrf.mxu0 }
 0x599   : > { %v1842_v0 = vadd.f32 %v3028_v63, %v3642_v27 }
 0x59a   : > { %v1836_v1 = vpop.f32.mrf.mxu0 }
 0x59b   : > { %v1837_v2 = vadd.f32 %v1836_v1, %v3640_v26  ;;  %v1848_v55 = vsel %vm788_vm5, %v1842_v0, -inf }
 0x59c   : > { %1849 = vmax.xlane.f32.xlu1 %v1848_v55 }
 0x59d   : > { %v1845_v3 = vsel %vm788_vm5, %v1837_v2, -inf }
 0x59e   : > { %1846 = vmax.xlane.f32.xlu0 %v1845_v3 }
 0x5a0   : > { %v3047_v5 = vpop.f32.mrf.mxu0 }
 0x5a1   : > { %v2372_v7 = vadd.f32 %v3047_v5, %v3642_v27 }
 0x5a2   : > { %v2366_v6 = vpop.f32.mrf.mxu0 }
 0x5a3   : > { %v2367_v8 = vadd.f32 %v2366_v6, %v3640_v26  ;;  %v2378_v9 = vsel %vm788_vm5, %v2372_v7, -inf }
 0x5a5   : > { %v2375_v10 = vsel %vm788_vm5, %v2367_v8, -inf }
 0x5a6   : > { %v3021_v58 = vpop.f32.mrf.mxu1 }
 0x5a7   : > { %v3725_v4 = vadd.f32 %v3021_v58, %v3016_v61 }
 0x5a8   : > { %v1515_v51 = vpop.f32.mrf.mxu1 }
 0x5ad   : > { %1877 = vrot.lane.b32.xlu1 %v3626_v16, %s3421_s29 }
 0x5b4   : > { %1879 = vrot.lane.b32.xlu0 %v3619_v15, %s3421_s29 }
 0x5d1   : > { %2379 = vmax.xlane.f32.xlu1 %v2378_v9 }
 0x5d3   : > { %2376 = vmax.xlane.f32.xlu0 %v2375_v10 }
 0x625   : > { %v1850_v11 = vpop.xlane.xlu1 %1849 }
 0x626   : > { %v1852_v12 = vmax.f32 %v1850_v11, -1e+30 }
 0x627   : > { %v1847_v13 = vpop.xlane.xlu0 %1846 }
 0x628   : > { %v1860_v18 = vsub.f32 %v1842_v0, %v1852_v12  ;;  %v1851_v19 = vmax.f32 %v1847_v13, -1e+30  ;;  %v1854_v41 = vsub.f32 -1e+30, %v1852_v12  ;;  %v2500_v0 = vld [vmem:[#allocation9 + $0x18] sm:$0xff]  ;;  %v1516_v13 = vadd.f32 %v1515_v51, %v3719_v62 }
 0x629   : > { %v1878_v27 = vpop.permute.xlu1 %1877 }
 0x62a   : > { %v1863_v20 = vmul.f32 1.442695, %v1860_v18  ;;  %v1859_v21 = vsub.f32 %v1837_v2, %v1851_v19  ;;  %v1853_v40 = vsub.f32 -1e+30, %v1851_v19  ;;  %v1857_v43 = vmul.f32 1.442695, %v1854_v41 }
 0x62b   : > { %v1880_v22 = vpop.permute.xlu0 %1879 }
 0x62c   : > { %v1861_v23 = vmul.f32 1.442695, %v1859_v21  ;;  %3029 = vmatprep.subr.mxu1 %v1880_v22  ;;  %3189 = vpow2.f32 %v1863_v20  ;;  %v1855_v42 = vmul.f32 1.442695, %v1853_v40 }
 0x62d   : > { %3030 = vmatpush3.msra.mxu1 %v1880_v22 }
 0x62e   : > { %3031 = vmatprep.subr.mxu1 %v1878_v27  ;;  %3191 = vpow2.f32 %v1861_v23 }
 0x62f   : > { %3032 = vmatpush3.msra.mxu1 %v1878_v27 }
 0x630   : > { %3036 = vmatprep.subr.mxu1 %v1970_v29 }
 0x639   : > { %v3190_v26 = vpop.eup %3189 }
 0x63a   : > { %v1870_v24 = vsel %vm788_vm5, %v3190_v26, 0.0 }
 0x63b   : > { %v3192_v25 = vpop.eup %3191  ;;  %1871 = vadd.xlane.f32.xlu0 %v1870_v24 }
 0x63c   : > { %3033 = vmatprep.mubr.msk.f32.mxu1 %vm788_vm5, %v3192_v25  ;;  %v1867_v28 = vsel %vm788_vm5, %v3192_v25, 0.0 }
 0x63d   : > { %1868 = vadd.xlane.f32.xlu1 %v1867_v28  ;;  %3034 = vmatmul.mubr.msk.f32.vlgmr.msra.gmra.mxu1 %vm788_vm5, %v3190_v26 }
 0x63e   : > { %3037 = vmatpush3.msra.mxu1 %v1970_v29 }
 0x64e   : > { %2407 = vrot.lane.b32.xlu1 %v3626_v16, %s3422_s5 }
 0x651   : > { %2409 = vrot.lane.b32.xlu0 %v3619_v15, %s3422_s5 }
 0x65a   : > { %v2380_v17 = vpop.xlane.xlu1 %2379 }
 0x65b   : > { %v2382_v30 = vmax.f32 %v2380_v17, -1e+30 }
 0x65c   : > { %v2377_v14 = vpop.xlane.xlu0 %2376 }
 0x65d   : > { %v2390_v31 = vsub.f32 %v2372_v7, %v2382_v30  ;;  %v2381_v32 = vmax.f32 %v2377_v14, -1e+30  ;;  %v2384_v2 = vsub.f32 -1e+30, %v2382_v30 }
 0x65f   : > { %v2393_v33 = vmul.f32 1.442695, %v2390_v31  ;;  %v2389_v34 = vsub.f32 %v2367_v8, %v2381_v32  ;;  %v2383_v1 = vsub.f32 -1e+30, %v2381_v32  ;;  %v2387_v3 = vmul.f32 1.442695, %v2384_v2 }
 0x661   : > { %v2391_v35 = vmul.f32 1.442695, %v2389_v34  ;;  %3193 = vpow2.f32 %v2393_v33  ;;  %v2385_v55 = vmul.f32 1.442695, %v2383_v1 }
 0x663   : > { %3195 = vpow2.f32 %v2391_v35 }
 0x664   : > { %3197 = vpow2.f32 %v1855_v42 }
 0x665   : > { %3199 = vpow2.f32 %v1857_v43 }
 0x66e   : > { %v3194_v36 = vpop.eup %3193 }
 0x66f   : > { %v2400_v37 = vsel %vm788_vm5, %v3194_v36, 0.0 }
 0x670   : > { %v3196_v38 = vpop.eup %3195  ;;  %2401 = vadd.xlane.f32.xlu0 %v2400_v37 }
 0x671   : > { %v2397_v39 = vsel %vm788_vm5, %v3196_v38, 0.0  ;;  %v3198_v44 = vpop.eup %3197 }
 0x672   : > { %2398 = vadd.xlane.f32.xlu1 %v2397_v39  ;;  %v3200_v45 = vpop.eup %3199  ;;  %v1865_v47 = vmul.f32 0.0, %v3198_v44 }
 0x673   : > { %v1866_v48 = vmul.f32 0.0, %v3200_v45 }
 0x6c4   : > { %v1872_v16 = vpop.xlane.xlu0 %1871 }
 0x6c5   : > { %v1874_v50 = vadd.f32 %v1872_v16, %v1866_v48 }
 0x6c6   : > { %v1869_v46 = vpop.xlane.xlu1 %1868 }
 0x6c7   : > { %v1873_v49 = vadd.f32 %v1869_v46, %v1865_v47 }
 0x6c8   : > { %v2410_v15 = vpop.permute.xlu0 %2409 }
 0x6c9   : > { %3048 = vmatprep.subr.mxu1 %v2410_v15  ;;  %3201 = vrcp.f32 %v1873_v49 }
 0x6ca   : > { %3203 = vrcp.f32 %v1874_v50  ;;  %v2408_v63 = vpop.permute.xlu1 %2407 }
 0x6cb   : > { %3205 = vpow2.f32 %v2385_v55 }
 0x6cc   : > { %3207 = vpow2.f32 %v2387_v3 }
 0x6d6   : > { %v3202_v59 = vpop.eup %3201 }
 0x6d7   : > { %v3204_v56 = vpop.eup %3203 }
 0x6d8   : > { %v3206_v58 = vpop.eup %3205 }
 0x6d9   : > { %v3208_v5 = vpop.eup %3207  ;;  %v2395_v8 = vmul.f32 0.0, %v3206_v58 }
 0x6da   : > { %v2396_v9 = vmul.f32 0.0, %v3208_v5 }
 0x6f9   : > { %v2402_v7 = vpop.xlane.xlu0 %2401 }
 0x6fa   : > { %v2404_v11 = vadd.f32 %v2402_v7, %v2396_v9 }
 0x6fb   : > { %v2399_v6 = vpop.xlane.xlu1 %2398 }
 0x6fc   : > { %v2403_v10 = vadd.f32 %v2399_v6, %v2395_v8 }
 0x6fd   : > { %v3035_v52 = vpop.f32.mrf.mxu1 }
 0x6fe   : > { %v1965_v54 = vadd.f32 %v3035_v52, %v1866_v48  ;;  %3209 = vrcp.f32 %v2403_v10 }
 0x6ff   : > { %v1955_v57 = vpop.f32.mrf.mxu1  ;;  %3211 = vrcp.f32 %v2404_v11 }
 0x700   : > { %v1964_v53 = vadd.f32 %v1955_v57, %v1865_v47  ;;  %v1969_v61 = vmul.f32 %v3204_v56, %v1965_v54 }
 0x702   : > { %v1968_v60 = vmul.f32 %v3202_v59, %v1964_v53 }
 0x704   : > { %3038 = vmatprep.mubr.msk.f32.mxu1 %vm700_vm2, %v1968_v60 }
 0x705   : > { %3039 = vmatmul.mubr.msk.f32.vlgmr.msra.gmra.mxu1 %vm700_vm2, %v1969_v61 }
 0x706   : > { %3049 = vmatpush3.msra.mxu1 %v2410_v15  ;;  %3052 = vmatprep.mubr.msk.f32.mxu1 %vm788_vm5, %v3196_v38 }
 0x707   : > { %3050 = vmatprep.subr.mxu1 %v2408_v63 }
 0x708   : > { %3051 = vmatpush3.msra.mxu1 %v2408_v63 }
 0x709   : > { %3053 = vmatmul.mubr.msk.f32.vlgmr.msra.gmra.mxu1 %vm788_vm5, %v3194_v36  ;;  %3055 = vmatprep.subr.mxu1 %v2500_v0 }
 0x70a   : > { %3056 = vmatpush3.msra.mxu1 %v2500_v0 }
 0x70b   : > { %v3210_v26 = vpop.eup %3209 }
 0x70c   : > { %v3212_v24 = vpop.eup %3211 }
 0x7c5   : > { %v3040_v12 = vpop.f32.mrf.mxu1 }
 0x7c6   : > { %v2053_v18 = vadd.f32 %v3040_v12, %v3725_v4 }
 0x7c7   : > { %v2043_v19 = vpop.f32.mrf.mxu1 }
 0x7c8   : > { %v2052_v20 = vadd.f32 %v2043_v19, %v1516_v13 }
 0x7c9   : > { %v3054_v21 = vpop.f32.mrf.mxu1 }
 0x7ca   : > { %v2495_v22 = vadd.f32 %v3054_v21, %v2396_v9 }
 0x7cb   : > { %v2485_v23 = vpop.f32.mrf.mxu1 }
 0x7cc   : > { %v2494_v27 = vadd.f32 %v2485_v23, %v2395_v8  ;;  %v2499_v28 = vmul.f32 %v3212_v24, %v2495_v22 }
 0x7ce   : > { %v2498_v25 = vmul.f32 %v3210_v26, %v2494_v27 }
 0x7d0   : > { %3057 = vmatprep.mubr.msk.f32.mxu1 %vm700_vm2, %v2498_v25 }
 0x7d1   : > { %3058 = vmatmul.mubr.msk.f32.vlgmr.msra.gmra.mxu1 %vm700_vm2, %v2499_v28 }
 0x891   : > { %v3059_v62 = vpop.f32.mrf.mxu1 }
 0x892   : > { %v2583_v4 = vadd.f32 %v3059_v62, %v2053_v18 }
 0x893   : > { %v2573_v29 = vpop.f32.mrf.mxu1 }
 0x894   : > { %2585 = vst [vmem:[%s273_s12 + $0x8] sm:$0xff] %v2583_v4  ;;  %v2582_v17 = vadd.f32 %v2573_v29, %v2052_v20 }
 0x896   : > { %2584 = vst [vmem:[%s273_s12] sm:$0xff] %v2582_v17 }
 0x897   : > { %3332 = shalt.err (!%p3329_p11)
}
 0x898   : > { %s3333_s27 = scalar_lea.hbm %s3757_s22, 256  ;;  %s3337_s29 = scalar_lea.hbm %s3809_s4, 512 }
 0x899   : > { %p3334_p10 = scmp.ne.s32.totalorder %s3757_s22, %s3333_s27  ;;  %p3338_p12 = scmp.lt.s32.totalorder %s3757_s22, %s3809_s4 }
 0x89a   : > { %p3339_p9 = scmp.lt.s32.totalorder %s3337_s29, %s3333_s27 }
 0x89b   : > { %p3335_p7 = pnand %p3334_p10, %p3823_p4 }
 0x89c   : > { %p3340_p5 = por %p3339_p9, %p3338_p12 }
 0x89d   : > { %p3336_p6 = pneg %p3335_p7 }
 0x89f   : > { %p3341_p1 = pnand %p3340_p5, %p3336_p6 }
 0x8a1   : > { %3344 = shalt.err (!%p3341_p1)
}
 0x8a2   : > { %s3424_s13 = smov 128   ;;  %s3425_s8 = smov 8  }
 0x8a3   : > { %3074 = dma.vmem_to_hbm [thread:$0]  (%p3823_p4), %s3752_s6, 256, %s3757_s22, %s2587_s28, %s3424_s13, %s3424_s13, %s3425_s8  }
 0x8a4 PF: > { %s2617_s21 = sand.u32 1, %s3387_s15   ;;  %p3824_p8 = scmp.ne.s32.totalorder %s3816_s26, 0 }
 0x8a5   : > { %p3825_p13 = scmp.ge.s32.totalorder %s3407_s20, 2  ;;  %s2618_s11 = scalar_lea.sflag [#allocation5], %s2617_s21 }
 0x8a7   : > { %p3091_p0 = pnand %p3825_p13, %p3824_p8 }
 0x8a9   : > { %p3092_p3 = pneg %p3091_p0 }
 0x8ab   : > { %3382 = dma.done.wait (%p3092_p3), %s2618_s11, 256  }
 0x8ac   : > { %3384 = vsyncadd (%p3092_p3), %s2618_s11, 4294967040  ;;  %s22_s20 = sadd.s32 1, %s3407_s20   ;;  %s3826_s15 = smov %s3391_s16 }
 0x8ad   : > { %p19_p2 = scmp.ge.s32.totalorder %s22_s20, 4   ;;  %s3827_s16 = smov %s3395_s17 }
 0x8ae   : > { %s3828_s17 = smov %s3572_s14  ;;  %s3829_s18 = smov %s3403_s19 }
 0x8af   : > { %s3830_s19 = smov %s3832_s30  ;;  %21 = sbr.rel (!%p19_p2) target bundleno = 8 (0x8), region = 175 }
 0x8b4   :  { %2623 = vsyncpa [#allocation4], 1 }
 0x8b5   :  { %2625 = vsyncpa [#allocation4 + $0x1], 1 }
 0x8b6   :  { %2626 = vsyncpa [#allocation7], 1 }
 0x8b7   :  { %2627 = vsyncpa [#allocation10], 1 }
 0x8b8   :  { %2628 = vsyncpa [#allocation5], 1 }
 0x8b9   :  { %2630 = vsyncpa [#allocation5 + $0x1], 1 }

</bundles_post_ra>
